<compile_context>
chip_gen: v5e
topology: v5e:2x2
jax: 0.10.0
libtpu: 0.0.40
codegen_flags: <defaults>
</compile_context>

<pallas_src>
import functools

import jax
import jax.numpy as jnp
from jax.experimental import pallas as pl
from jax.experimental.pallas import tpu as pltpu


_SMALL_CONTRACTION = 16   # K this small stays on the VPU, not the MXU
_SMALL_OUTPUT = 8         # M this small stays on the VPU, not the MXU
_LANE = 128


def _activation(h, name):
    if name == "sigmoid":
        return jax.nn.sigmoid(h)
    if name == "GeLU":
        return jax.nn.gelu(h, approximate=False)   # matches nn.GELU (erf form)
    return jnp.maximum(h, 0.0)                     # ReLU (default)


def _matmul_t(w, h):
    """w @ h with w:(out, in) (PyTorch layout), h:(in, TB).

    Small K or tiny output-row count -> unrolled broadcast-FMAs on the VPU
    (a degenerate MXU matmul is just push/pop on the critical path)."""
    out_f, k = w.shape
    if k <= _SMALL_CONTRACTION or out_f <= _SMALL_OUTPUT:
        acc = w[:, 0:1] * h[0:1, :]
        for i in range(1, k):
            acc = acc + w[:, i:i + 1] * h[i:i + 1, :]
        return acc
    return jnp.dot(w, h, preferred_element_type=jnp.float32)


def _gennet_kernel(*refs, equiv, skip, activation, n_seq_layers, din):
    """One batch tile, feature-major (features, TB), entirely in VMEM/vregs.

    Ref order (inputs):
      xT,
      [bi, we, be, ws, bs]            (only when equiv == True),
      w0, b0, w1, b1, ..., w_{L-1}, b_{L-1}
    last ref is the (out_dim, TB) output tile.
    Weights are PyTorch-layout (out, in); biases are (out, 1) columns.
    """
    out_ref = refs[-1]
    in_refs = list(refs[:-1])

    xT = in_refs.pop(0)[...]            # (Din, TB) float32

    if equiv:
        bi = in_refs.pop(0)[...]        # (Din, Din), symmetric
        we = in_refs.pop(0)[...]        # (Din, 1)   equiv_layer weight (out, in=1)
        be = in_refs.pop(0)[...]        # (Din, 1)
        ws = in_refs.pop(0)[...]        # (Din, Din) skip_layer weight (out, in)
        bs = in_refs.pop(0)[...]        # (Din, 1)

        # Bilinear form q_b = x_b^T B x_b (x^T B x == x^T B^T x, so the
        # orientation of `bi` is immaterial).  Din is tiny -> VPU FMAs, then
        # a cheap sublane reduction over Din rows.
        t = _matmul_t(bi, xT)                                   # (Din, TB)
        q = jnp.sum(t * xT, axis=0, keepdims=True)              # (1,  TB)

        # equiv_layer is Linear(1, Din): a K=1 matmul is a broadcast multiply.
        y = we * q + be                                         # (Din, TB)

        if skip:
            y = y + _matmul_t(ws, xT) + bs
    else:
        y = xT

    # sequential: Linear+act repeated, final Linear without activation.
    h = y
    for layer in range(n_seq_layers):
        w = in_refs.pop(0)[...]          # (out_l, in_l)
        b = in_refs.pop(0)[...]          # (out_l, 1)
        h = _matmul_t(w, h) + b
        if layer < n_seq_layers - 1:
            h = _activation(h, activation)

    out_ref[...] = h.astype(out_ref.dtype)


def _round_up(n, m):
    return ((n + m - 1) // m) * m


def gennet_forward(x, params, *, equiv, skip, activation, block_batch=None):
    """Tiles the batch along the lane axis, builds BlockSpecs, calls Pallas."""
    batch, din = x.shape
    seq_ws = list(params["seq_w"])                          # PyTorch (out, in)
    seq_bs = [b.reshape(-1, 1) for b in params["seq_b"]]    # (out, 1) columns
    n_seq_layers = len(seq_ws)
    out_dim = seq_ws[-1].shape[0]

    # ---- batch tiling (batch lives on the 128-wide lane axis) --------------
    tb = 4096 if block_batch is None else block_batch
    tb = max(_LANE, _round_up(tb, _LANE))
    tb = min(tb, _round_up(batch, _LANE))
    b_pad = _round_up(batch, tb)
    grid = (b_pad // tb,)

    x_p = x if b_pad == batch else jnp.pad(x, ((0, b_pad - batch), (0, 0)))
    xT = x_p.T                                              # (Din, b_pad)

    operands = [xT]
    if equiv:
        operands += [params["bi"],
                     params["we"], params["be"].reshape(-1, 1),
                     params["ws"], params["bs"].reshape(-1, 1)]
    for w, b in zip(seq_ws, seq_bs):
        operands += [w, b]

    def const_spec(arr):
        # Whole array, same block every grid step -> stays VMEM-resident.
        return pl.BlockSpec(arr.shape, lambda i: (0,) * arr.ndim)

    in_specs = [pl.BlockSpec((din, tb), lambda i: (0, i))]
    in_specs += [const_spec(a) for a in operands[1:]]
    out_specs = pl.BlockSpec((out_dim, tb), lambda i: (0, i))

    # ---- cost estimate (cheap, mem/overhead-bound kernel) ------------------
    flops_row = 0
    transc_row = 0
    if equiv:
        flops_row += 2 * din * din + 2 * din      # bilinear form
        flops_row += 2 * din                      # equiv_layer
        if skip:
            flops_row += 2 * din * din + din
    for li, w in enumerate(seq_ws):
        fo, fi = w.shape
        flops_row += 2 * fi * fo + fo
        if li < n_seq_layers - 1 and activation in ("sigmoid", "GeLU"):
            transc_row += fo
    weight_bytes = int(sum(int(a.size) for a in operands[1:]) * 4)
    cost = pl.CostEstimate(
        flops=int(flops_row) * b_pad,
        transcendentals=int(transc_row) * b_pad,
        bytes_accessed=int(b_pad * (din + out_dim) * 4 + weight_bytes),
    )

    # ---- VMEM budget: 2x buffered x/out tiles + resident weights + live act
    h_max = max([din] + [w.shape[0] for w in seq_ws])
    per_lane_bytes = 4 * (2 * din + 2 * out_dim + 3 * h_max)
    vmem_needed = tb * per_lane_bytes + 2 * weight_bytes + (2 << 20)
    vmem_limit = int(min(max(vmem_needed, 16 << 20), 32 << 20))  # safe on v7x

    kernel = functools.partial(
        _gennet_kernel,
        equiv=equiv, skip=skip, activation=activation,
        n_seq_layers=n_seq_layers, din=din,
    )

    out = pl.pallas_call(
        kernel,
        out_shape=jax.ShapeDtypeStruct((out_dim, b_pad), jnp.float32),
        grid=grid,
        in_specs=in_specs,
        out_specs=out_specs,
        compiler_params=pltpu.CompilerParams(
            dimension_semantics=("parallel",),
            vmem_limit_bytes=vmem_limit,
        ),
        cost_estimate=cost,
    )(*operands)
    return out[:, :batch].T                                  # (batch, out_dim)


def init_gennet_params(key, *, input_size=4, output_size=1, hidden_size=32,
                       n_hidden_layers=3, init="rand"):
    """Synthetic init mimicking nn.Linear's U(-1/sqrt(fan_in), +1/sqrt(fan_in)).

    Weights are kept in PyTorch layout (out_features, in_features)."""
    def linear(key, fan_in, fan_out):
        kw, kb = jax.random.split(key)
        bound = 1.0 / jnp.sqrt(jnp.float32(fan_in))
        w = jax.random.uniform(kw, (fan_out, fan_in), jnp.float32, -bound, bound)
        b = jax.random.uniform(kb, (fan_out,), jnp.float32, -bound, bound)
        return w, b

    keys = jax.random.split(key, 8 + n_hidden_layers)
    params = {}

    # bi_tensor: symmetric (input_size, input_size)
    if init == "eta":
        diag = -jnp.ones((input_size,), jnp.float32).at[0].set(1.0)
        bi = jnp.diag(diag)
    elif init == "delta":
        bi = jnp.eye(input_size, dtype=jnp.float32)
    else:
        bi = jax.random.normal(keys[0], (input_size, input_size), jnp.float32)
    params["bi"] = 0.5 * (bi + bi.T)

    # equiv_layer: Linear(1, input_size) -> weight (input_size, 1)
    params["we"], params["be"] = linear(keys[1], 1, input_size)
    # skip_layer: Linear(input_size, input_size)
    params["ws"], params["bs"] = linear(keys[2], input_size, input_size)

    # sequential: Linear(in,h), [Linear(h,h)]*n_hidden_layers, Linear(h,out)
    seq_w, seq_b = [], []
    w, b = linear(keys[3], input_size, hidden_size)
    seq_w.append(w); seq_b.append(b)
    for i in range(n_hidden_layers):
        w, b = linear(keys[4 + i], hidden_size, hidden_size)
        seq_w.append(w); seq_b.append(b)
    w, b = linear(keys[4 + n_hidden_layers], hidden_size, output_size)
    seq_w.append(w); seq_b.append(b)
    params["seq_w"] = seq_w
    params["seq_b"] = seq_b
    return params


def gennet_reference(x, params, *, equiv, skip, activation):
    """Pure-JAX reference (PyTorch-layout weights: y = x @ W.T + b)."""
    if equiv:
        q = jnp.einsum("bi,ij,bj->b", x, params["bi"], x)[:, None]
        y = q @ params["we"].T + params["be"]
        if skip:
            y = y + x @ params["ws"].T + params["bs"]
    else:
        y = x
    h = y
    n = len(params["seq_w"])
    for i, (w, b) in enumerate(zip(params["seq_w"], params["seq_b"])):
        h = h @ w.T + b
        if i < n - 1:
            h = _activation(h, activation)
    return h


if __name__ == "__main__":
    INPUT_SIZE = 4
    OUTPUT_SIZE = 1
    HIDDEN_SIZE = 32
    N_HIDDEN_LAYERS = 3
    BATCH = 300   # deliberately not a multiple of the lane/batch tile

    key = jax.random.PRNGKey(0)
    kx, kp = jax.random.split(key)
    x = jax.random.normal(kx, (BATCH, INPUT_SIZE), jnp.float32)

    params = init_gennet_params(
        kp, input_size=INPUT_SIZE, output_size=OUTPUT_SIZE,
        hidden_size=HIDDEN_SIZE, n_hidden_layers=N_HIDDEN_LAYERS, init="rand")

    # Full forward: equiv='True', skip='True', ReLU; grid of 3 batch tiles.
    out = gennet_forward(x, params, equiv=True, skip=True,
                         activation="ReLU", block_batch=128)
    out = jax.block_until_ready(out)
    ref = gennet_reference(x, params, equiv=True, skip=True, activation="ReLU")
    assert out.shape == (BATCH, OUTPUT_SIZE)
    assert jnp.allclose(out, ref, atol=1e-5, rtol=1e-5), \
        float(jnp.max(jnp.abs(out - ref)))

    # equiv='False' passthrough with GeLU, single (full) batch tile.
    out2 = jax.block_until_ready(
        gennet_forward(x, params, equiv=False, skip=False, activation="GeLU"))
    ref2 = gennet_reference(x, params, equiv=False, skip=False,
                            activation="GeLU")
    assert jnp.allclose(out2, ref2, atol=1e-5, rtol=1e-5), \
        float(jnp.max(jnp.abs(out2 - ref2)))

    print("KERNEL_OK")
</pallas_src>

<mosaic_0001>
module attributes {stable_mosaic.version = 11 : i64} {
  func.func @_gennet_kernel(%arg0: i32, %arg1: memref<4x128xf32, #tpu.memory_space<vmem>>, %arg2: memref<4x4xf32, #tpu.memory_space<vmem>>, %arg3: memref<4x1xf32, #tpu.memory_space<vmem>>, %arg4: memref<4x1xf32, #tpu.memory_space<vmem>>, %arg5: memref<4x4xf32, #tpu.memory_space<vmem>>, %arg6: memref<4x1xf32, #tpu.memory_space<vmem>>, %arg7: memref<32x4xf32, #tpu.memory_space<vmem>>, %arg8: memref<32x1xf32, #tpu.memory_space<vmem>>, %arg9: memref<32x32xf32, #tpu.memory_space<vmem>>, %arg10: memref<32x1xf32, #tpu.memory_space<vmem>>, %arg11: memref<32x32xf32, #tpu.memory_space<vmem>>, %arg12: memref<32x1xf32, #tpu.memory_space<vmem>>, %arg13: memref<32x32xf32, #tpu.memory_space<vmem>>, %arg14: memref<32x1xf32, #tpu.memory_space<vmem>>, %arg15: memref<1x32xf32, #tpu.memory_space<vmem>>, %arg16: memref<1x1xf32, #tpu.memory_space<vmem>>, %arg17: memref<1x128xf32, #tpu.memory_space<vmem>>) attributes {dimension_semantics = [#tpu.dimension_semantics<parallel>], iteration_bounds = array<i64: 3>, scalar_prefetch = 0 : i64, scratch_operands = 0 : i64, tpu.core_type = #tpu.core_type<tc>, window_params = [{transform_indices = @transform_0, window_bounds = array<i64: 4, 128>}, {pipeline_mode = #tpu.pipeline_mode<synchronous>, transform_indices = @transform_1, window_bounds = array<i64: 4, 4>}, {pipeline_mode = #tpu.pipeline_mode<synchronous>, transform_indices = @transform_2, window_bounds = array<i64: 4, 1>}, {pipeline_mode = #tpu.pipeline_mode<synchronous>, transform_indices = @transform_3, window_bounds = array<i64: 4, 1>}, {pipeline_mode = #tpu.pipeline_mode<synchronous>, transform_indices = @transform_4, window_bounds = array<i64: 4, 4>}, {pipeline_mode = #tpu.pipeline_mode<synchronous>, transform_indices = @transform_5, window_bounds = array<i64: 4, 1>}, {pipeline_mode = #tpu.pipeline_mode<synchronous>, transform_indices = @transform_6, window_bounds = array<i64: 32, 4>}, {pipeline_mode = #tpu.pipeline_mode<synchronous>, transform_indices = @transform_7, window_bounds = array<i64: 32, 1>}, {pipeline_mode = #tpu.pipeline_mode<synchronous>, transform_indices = @transform_8, window_bounds = array<i64: 32, 32>}, {pipeline_mode = #tpu.pipeline_mode<synchronous>, transform_indices = @transform_9, window_bounds = array<i64: 32, 1>}, {pipeline_mode = #tpu.pipeline_mode<synchronous>, transform_indices = @transform_10, window_bounds = array<i64: 32, 32>}, {pipeline_mode = #tpu.pipeline_mode<synchronous>, transform_indices = @transform_11, window_bounds = array<i64: 32, 1>}, {pipeline_mode = #tpu.pipeline_mode<synchronous>, transform_indices = @transform_12, window_bounds = array<i64: 32, 32>}, {pipeline_mode = #tpu.pipeline_mode<synchronous>, transform_indices = @transform_13, window_bounds = array<i64: 32, 1>}, {pipeline_mode = #tpu.pipeline_mode<synchronous>, transform_indices = @transform_14, window_bounds = array<i64: 1, 32>}, {pipeline_mode = #tpu.pipeline_mode<synchronous>, transform_indices = @transform_15, window_bounds = array<i64: 1, 1>}, {transform_indices = @transform_16, window_bounds = array<i64: 1, 128>}]} {
    %c0 = arith.constant 0 : index
    %c0_0 = arith.constant 0 : index
    %0 = vector.load %arg1[%c0, %c0_0] : memref<4x128xf32, #tpu.memory_space<vmem>>, vector<4x128xf32>
    %c0_1 = arith.constant 0 : index
    %c0_2 = arith.constant 0 : index
    %1 = vector.load %arg2[%c0_1, %c0_2] : memref<4x4xf32, #tpu.memory_space<vmem>>, vector<4x4xf32>
    %c0_3 = arith.constant 0 : index
    %c0_4 = arith.constant 0 : index
    %2 = vector.load %arg3[%c0_3, %c0_4] : memref<4x1xf32, #tpu.memory_space<vmem>>, vector<4x1xf32>
    %c0_5 = arith.constant 0 : index
    %c0_6 = arith.constant 0 : index
    %3 = vector.load %arg4[%c0_5, %c0_6] : memref<4x1xf32, #tpu.memory_space<vmem>>, vector<4x1xf32>
    %c0_7 = arith.constant 0 : index
    %c0_8 = arith.constant 0 : index
    %4 = vector.load %arg5[%c0_7, %c0_8] : memref<4x4xf32, #tpu.memory_space<vmem>>, vector<4x4xf32>
    %c0_9 = arith.constant 0 : index
    %c0_10 = arith.constant 0 : index
    %5 = vector.load %arg6[%c0_9, %c0_10] : memref<4x1xf32, #tpu.memory_space<vmem>>, vector<4x1xf32>
    %6 = vector.extract_strided_slice %1 {offsets = [0, 0], sizes = [4, 1], strides = [1, 1]} : vector<4x4xf32> to vector<4x1xf32>
    %7 = vector.extract_strided_slice %0 {offsets = [0, 0], sizes = [1, 128], strides = [1, 1]} : vector<4x128xf32> to vector<1x128xf32>
    %8 = vector.broadcast %6 : vector<4x1xf32> to vector<4x128xf32>
    %9 = vector.broadcast %7 : vector<1x128xf32> to vector<4x128xf32>
    %10 = arith.mulf %8, %9 : vector<4x128xf32>
    %11 = vector.extract_strided_slice %1 {offsets = [0, 1], sizes = [4, 1], strides = [1, 1]} : vector<4x4xf32> to vector<4x1xf32>
    %12 = vector.extract_strided_slice %0 {offsets = [1, 0], sizes = [1, 128], strides = [1, 1]} : vector<4x128xf32> to vector<1x128xf32>
    %13 = vector.broadcast %11 : vector<4x1xf32> to vector<4x128xf32>
    %14 = vector.broadcast %12 : vector<1x128xf32> to vector<4x128xf32>
    %15 = arith.mulf %13, %14 : vector<4x128xf32>
    %16 = arith.addf %10, %15 : vector<4x128xf32>
    %17 = vector.extract_strided_slice %1 {offsets = [0, 2], sizes = [4, 1], strides = [1, 1]} : vector<4x4xf32> to vector<4x1xf32>
    %18 = vector.extract_strided_slice %0 {offsets = [2, 0], sizes = [1, 128], strides = [1, 1]} : vector<4x128xf32> to vector<1x128xf32>
    %19 = vector.broadcast %17 : vector<4x1xf32> to vector<4x128xf32>
    %20 = vector.broadcast %18 : vector<1x128xf32> to vector<4x128xf32>
    %21 = arith.mulf %19, %20 : vector<4x128xf32>
    %22 = arith.addf %16, %21 : vector<4x128xf32>
    %23 = vector.extract_strided_slice %1 {offsets = [0, 3], sizes = [4, 1], strides = [1, 1]} : vector<4x4xf32> to vector<4x1xf32>
    %24 = vector.extract_strided_slice %0 {offsets = [3, 0], sizes = [1, 128], strides = [1, 1]} : vector<4x128xf32> to vector<1x128xf32>
    %25 = vector.broadcast %23 : vector<4x1xf32> to vector<4x128xf32>
    %26 = vector.broadcast %24 : vector<1x128xf32> to vector<4x128xf32>
    %27 = arith.mulf %25, %26 : vector<4x128xf32>
    %28 = arith.addf %22, %27 : vector<4x128xf32>
    %29 = arith.mulf %28, %0 : vector<4x128xf32>
    %cst = arith.constant dense<0.000000e+00> : vector<128xf32>
    %30 = vector.multi_reduction <add>, %29, %cst [0] : vector<4x128xf32> to vector<128xf32>
    %31 = vector.shape_cast %30 : vector<128xf32> to vector<1x128xf32>
    %32 = vector.broadcast %2 : vector<4x1xf32> to vector<4x128xf32>
    %33 = vector.broadcast %31 : vector<1x128xf32> to vector<4x128xf32>
    %34 = arith.mulf %32, %33 : vector<4x128xf32>
    %35 = vector.broadcast %3 : vector<4x1xf32> to vector<4x128xf32>
    %36 = arith.addf %34, %35 : vector<4x128xf32>
    %37 = vector.extract_strided_slice %4 {offsets = [0, 0], sizes = [4, 1], strides = [1, 1]} : vector<4x4xf32> to vector<4x1xf32>
    %38 = vector.extract_strided_slice %0 {offsets = [0, 0], sizes = [1, 128], strides = [1, 1]} : vector<4x128xf32> to vector<1x128xf32>
    %39 = vector.broadcast %37 : vector<4x1xf32> to vector<4x128xf32>
    %40 = vector.broadcast %38 : vector<1x128xf32> to vector<4x128xf32>
    %41 = arith.mulf %39, %40 : vector<4x128xf32>
    %42 = vector.extract_strided_slice %4 {offsets = [0, 1], sizes = [4, 1], strides = [1, 1]} : vector<4x4xf32> to vector<4x1xf32>
    %43 = vector.extract_strided_slice %0 {offsets = [1, 0], sizes = [1, 128], strides = [1, 1]} : vector<4x128xf32> to vector<1x128xf32>
    %44 = vector.broadcast %42 : vector<4x1xf32> to vector<4x128xf32>
    %45 = vector.broadcast %43 : vector<1x128xf32> to vector<4x128xf32>
    %46 = arith.mulf %44, %45 : vector<4x128xf32>
    %47 = arith.addf %41, %46 : vector<4x128xf32>
    %48 = vector.extract_strided_slice %4 {offsets = [0, 2], sizes = [4, 1], strides = [1, 1]} : vector<4x4xf32> to vector<4x1xf32>
    %49 = vector.extract_strided_slice %0 {offsets = [2, 0], sizes = [1, 128], strides = [1, 1]} : vector<4x128xf32> to vector<1x128xf32>
    %50 = vector.broadcast %48 : vector<4x1xf32> to vector<4x128xf32>
    %51 = vector.broadcast %49 : vector<1x128xf32> to vector<4x128xf32>
    %52 = arith.mulf %50, %51 : vector<4x128xf32>
    %53 = arith.addf %47, %52 : vector<4x128xf32>
    %54 = vector.extract_strided_slice %4 {offsets = [0, 3], sizes = [4, 1], strides = [1, 1]} : vector<4x4xf32> to vector<4x1xf32>
    %55 = vector.extract_strided_slice %0 {offsets = [3, 0], sizes = [1, 128], strides = [1, 1]} : vector<4x128xf32> to vector<1x128xf32>
    %56 = vector.broadcast %54 : vector<4x1xf32> to vector<4x128xf32>
    %57 = vector.broadcast %55 : vector<1x128xf32> to vector<4x128xf32>
    %58 = arith.mulf %56, %57 : vector<4x128xf32>
    %59 = arith.addf %53, %58 : vector<4x128xf32>
    %60 = arith.addf %36, %59 : vector<4x128xf32>
    %61 = vector.broadcast %5 : vector<4x1xf32> to vector<4x128xf32>
    %62 = arith.addf %60, %61 : vector<4x128xf32>
    %c0_11 = arith.constant 0 : index
    %c0_12 = arith.constant 0 : index
    %63 = vector.load %arg7[%c0_11, %c0_12] : memref<32x4xf32, #tpu.memory_space<vmem>>, vector<32x4xf32>
    %c0_13 = arith.constant 0 : index
    %c0_14 = arith.constant 0 : index
    %64 = vector.load %arg8[%c0_13, %c0_14] : memref<32x1xf32, #tpu.memory_space<vmem>>, vector<32x1xf32>
    %65 = vector.extract_strided_slice %63 {offsets = [0, 0], sizes = [32, 1], strides = [1, 1]} : vector<32x4xf32> to vector<32x1xf32>
    %66 = vector.extract_strided_slice %62 {offsets = [0, 0], sizes = [1, 128], strides = [1, 1]} : vector<4x128xf32> to vector<1x128xf32>
    %67 = vector.broadcast %65 : vector<32x1xf32> to vector<32x128xf32>
    %68 = vector.broadcast %66 : vector<1x128xf32> to vector<32x128xf32>
    %69 = arith.mulf %67, %68 : vector<32x128xf32>
    %70 = vector.extract_strided_slice %63 {offsets = [0, 1], sizes = [32, 1], strides = [1, 1]} : vector<32x4xf32> to vector<32x1xf32>
    %71 = vector.extract_strided_slice %62 {offsets = [1, 0], sizes = [1, 128], strides = [1, 1]} : vector<4x128xf32> to vector<1x128xf32>
    %72 = vector.broadcast %70 : vector<32x1xf32> to vector<32x128xf32>
    %73 = vector.broadcast %71 : vector<1x128xf32> to vector<32x128xf32>
    %74 = arith.mulf %72, %73 : vector<32x128xf32>
    %75 = arith.addf %69, %74 : vector<32x128xf32>
    %76 = vector.extract_strided_slice %63 {offsets = [0, 2], sizes = [32, 1], strides = [1, 1]} : vector<32x4xf32> to vector<32x1xf32>
    %77 = vector.extract_strided_slice %62 {offsets = [2, 0], sizes = [1, 128], strides = [1, 1]} : vector<4x128xf32> to vector<1x128xf32>
    %78 = vector.broadcast %76 : vector<32x1xf32> to vector<32x128xf32>
    %79 = vector.broadcast %77 : vector<1x128xf32> to vector<32x128xf32>
    %80 = arith.mulf %78, %79 : vector<32x128xf32>
    %81 = arith.addf %75, %80 : vector<32x128xf32>
    %82 = vector.extract_strided_slice %63 {offsets = [0, 3], sizes = [32, 1], strides = [1, 1]} : vector<32x4xf32> to vector<32x1xf32>
    %83 = vector.extract_strided_slice %62 {offsets = [3, 0], sizes = [1, 128], strides = [1, 1]} : vector<4x128xf32> to vector<1x128xf32>
    %84 = vector.broadcast %82 : vector<32x1xf32> to vector<32x128xf32>
    %85 = vector.broadcast %83 : vector<1x128xf32> to vector<32x128xf32>
    %86 = arith.mulf %84, %85 : vector<32x128xf32>
    %87 = arith.addf %81, %86 : vector<32x128xf32>
    %88 = vector.broadcast %64 : vector<32x1xf32> to vector<32x128xf32>
    %89 = arith.addf %87, %88 : vector<32x128xf32>
    %cst_15 = arith.constant 0.000000e+00 : f32
    %90 = vector.broadcast %cst_15 : f32 to vector<32x128xf32>
    %91 = arith.maximumf %89, %90 : vector<32x128xf32>
    %c0_16 = arith.constant 0 : index
    %c0_17 = arith.constant 0 : index
    %92 = vector.load %arg9[%c0_16, %c0_17] : memref<32x32xf32, #tpu.memory_space<vmem>>, vector<32x32xf32>
    %c0_18 = arith.constant 0 : index
    %c0_19 = arith.constant 0 : index
    %93 = vector.load %arg10[%c0_18, %c0_19] : memref<32x1xf32, #tpu.memory_space<vmem>>, vector<32x1xf32>
    %cst_20 = arith.constant dense<0.000000e+00> : vector<32x128xf32>
    %94 = tpu.matmul %92, %91, %cst_20 {dimension_numbers = #tpu.dot_dimension_numbers<[1], [0], [0], [1], [0, 0, 1, 1], [], []>} : vector<32x32xf32>, vector<32x128xf32>, vector<32x128xf32> -> vector<32x128xf32>
    %95 = vector.broadcast %93 : vector<32x1xf32> to vector<32x128xf32>
    %96 = arith.addf %94, %95 : vector<32x128xf32>
    %cst_21 = arith.constant 0.000000e+00 : f32
    %97 = vector.broadcast %cst_21 : f32 to vector<32x128xf32>
    %98 = arith.maximumf %96, %97 : vector<32x128xf32>
    %c0_22 = arith.constant 0 : index
    %c0_23 = arith.constant 0 : index
    %99 = vector.load %arg11[%c0_22, %c0_23] : memref<32x32xf32, #tpu.memory_space<vmem>>, vector<32x32xf32>
    %c0_24 = arith.constant 0 : index
    %c0_25 = arith.constant 0 : index
    %100 = vector.load %arg12[%c0_24, %c0_25] : memref<32x1xf32, #tpu.memory_space<vmem>>, vector<32x1xf32>
    %cst_26 = arith.constant dense<0.000000e+00> : vector<32x128xf32>
    %101 = tpu.matmul %99, %98, %cst_26 {dimension_numbers = #tpu.dot_dimension_numbers<[1], [0], [0], [1], [0, 0, 1, 1], [], []>} : vector<32x32xf32>, vector<32x128xf32>, vector<32x128xf32> -> vector<32x128xf32>
    %102 = vector.broadcast %100 : vector<32x1xf32> to vector<32x128xf32>
    %103 = arith.addf %101, %102 : vector<32x128xf32>
    %cst_27 = arith.constant 0.000000e+00 : f32
    %104 = vector.broadcast %cst_27 : f32 to vector<32x128xf32>
    %105 = arith.maximumf %103, %104 : vector<32x128xf32>
    %c0_28 = arith.constant 0 : index
    %c0_29 = arith.constant 0 : index
    %106 = vector.load %arg13[%c0_28, %c0_29] : memref<32x32xf32, #tpu.memory_space<vmem>>, vector<32x32xf32>
    %c0_30 = arith.constant 0 : index
    %c0_31 = arith.constant 0 : index
    %107 = vector.load %arg14[%c0_30, %c0_31] : memref<32x1xf32, #tpu.memory_space<vmem>>, vector<32x1xf32>
    %cst_32 = arith.constant dense<0.000000e+00> : vector<32x128xf32>
    %108 = tpu.matmul %106, %105, %cst_32 {dimension_numbers = #tpu.dot_dimension_numbers<[1], [0], [0], [1], [0, 0, 1, 1], [], []>} : vector<32x32xf32>, vector<32x128xf32>, vector<32x128xf32> -> vector<32x128xf32>
    %109 = vector.broadcast %107 : vector<32x1xf32> to vector<32x128xf32>
    %110 = arith.addf %108, %109 : vector<32x128xf32>
    %cst_33 = arith.constant 0.000000e+00 : f32
    %111 = vector.broadcast %cst_33 : f32 to vector<32x128xf32>
    %112 = arith.maximumf %110, %111 : vector<32x128xf32>
    %c0_34 = arith.constant 0 : index
    %c0_35 = arith.constant 0 : index
    %113 = vector.load %arg15[%c0_34, %c0_35] : memref<1x32xf32, #tpu.memory_space<vmem>>, vector<1x32xf32>
    %c0_36 = arith.constant 0 : index
    %c0_37 = arith.constant 0 : index
    %114 = vector.load %arg16[%c0_36, %c0_37] : memref<1x1xf32, #tpu.memory_space<vmem>>, vector<1x1xf32>
    %115 = vector.extract_strided_slice %113 {offsets = [0, 0], sizes = [1, 1], strides = [1, 1]} : vector<1x32xf32> to vector<1x1xf32>
    %116 = vector.extract_strided_slice %112 {offsets = [0, 0], sizes = [1, 128], strides = [1, 1]} : vector<32x128xf32> to vector<1x128xf32>
    %117 = vector.broadcast %115 : vector<1x1xf32> to vector<1x128xf32>
    %118 = arith.mulf %117, %116 : vector<1x128xf32>
    %119 = vector.extract_strided_slice %113 {offsets = [0, 1], sizes = [1, 1], strides = [1, 1]} : vector<1x32xf32> to vector<1x1xf32>
    %120 = vector.extract_strided_slice %112 {offsets = [1, 0], sizes = [1, 128], strides = [1, 1]} : vector<32x128xf32> to vector<1x128xf32>
    %121 = vector.broadcast %119 : vector<1x1xf32> to vector<1x128xf32>
    %122 = arith.mulf %121, %120 : vector<1x128xf32>
    %123 = arith.addf %118, %122 : vector<1x128xf32>
    %124 = vector.extract_strided_slice %113 {offsets = [0, 2], sizes = [1, 1], strides = [1, 1]} : vector<1x32xf32> to vector<1x1xf32>
    %125 = vector.extract_strided_slice %112 {offsets = [2, 0], sizes = [1, 128], strides = [1, 1]} : vector<32x128xf32> to vector<1x128xf32>
    %126 = vector.broadcast %124 : vector<1x1xf32> to vector<1x128xf32>
    %127 = arith.mulf %126, %125 : vector<1x128xf32>
    %128 = arith.addf %123, %127 : vector<1x128xf32>
    %129 = vector.extract_strided_slice %113 {offsets = [0, 3], sizes = [1, 1], strides = [1, 1]} : vector<1x32xf32> to vector<1x1xf32>
    %130 = vector.extract_strided_slice %112 {offsets = [3, 0], sizes = [1, 128], strides = [1, 1]} : vector<32x128xf32> to vector<1x128xf32>
    %131 = vector.broadcast %129 : vector<1x1xf32> to vector<1x128xf32>
    %132 = arith.mulf %131, %130 : vector<1x128xf32>
    %133 = arith.addf %128, %132 : vector<1x128xf32>
    %134 = vector.extract_strided_slice %113 {offsets = [0, 4], sizes = [1, 1], strides = [1, 1]} : vector<1x32xf32> to vector<1x1xf32>
    %135 = vector.extract_strided_slice %112 {offsets = [4, 0], sizes = [1, 128], strides = [1, 1]} : vector<32x128xf32> to vector<1x128xf32>
    %136 = vector.broadcast %134 : vector<1x1xf32> to vector<1x128xf32>
    %137 = arith.mulf %136, %135 : vector<1x128xf32>
    %138 = arith.addf %133, %137 : vector<1x128xf32>
    %139 = vector.extract_strided_slice %113 {offsets = [0, 5], sizes = [1, 1], strides = [1, 1]} : vector<1x32xf32> to vector<1x1xf32>
    %140 = vector.extract_strided_slice %112 {offsets = [5, 0], sizes = [1, 128], strides = [1, 1]} : vector<32x128xf32> to vector<1x128xf32>
    %141 = vector.broadcast %139 : vector<1x1xf32> to vector<1x128xf32>
    %142 = arith.mulf %141, %140 : vector<1x128xf32>
    %143 = arith.addf %138, %142 : vector<1x128xf32>
    %144 = vector.extract_strided_slice %113 {offsets = [0, 6], sizes = [1, 1], strides = [1, 1]} : vector<1x32xf32> to vector<1x1xf32>
    %145 = vector.extract_strided_slice %112 {offsets = [6, 0], sizes = [1, 128], strides = [1, 1]} : vector<32x128xf32> to vector<1x128xf32>
    %146 = vector.broadcast %144 : vector<1x1xf32> to vector<1x128xf32>
    %147 = arith.mulf %146, %145 : vector<1x128xf32>
    %148 = arith.addf %143, %147 : vector<1x128xf32>
    %149 = vector.extract_strided_slice %113 {offsets = [0, 7], sizes = [1, 1], strides = [1, 1]} : vector<1x32xf32> to vector<1x1xf32>
    %150 = vector.extract_strided_slice %112 {offsets = [7, 0], sizes = [1, 128], strides = [1, 1]} : vector<32x128xf32> to vector<1x128xf32>
    %151 = vector.broadcast %149 : vector<1x1xf32> to vector<1x128xf32>
    %152 = arith.mulf %151, %150 : vector<1x128xf32>
    %153 = arith.addf %148, %152 : vector<1x128xf32>
    %154 = vector.extract_strided_slice %113 {offsets = [0, 8], sizes = [1, 1], strides = [1, 1]} : vector<1x32xf32> to vector<1x1xf32>
    %155 = vector.extract_strided_slice %112 {offsets = [8, 0], sizes = [1, 128], strides = [1, 1]} : vector<32x128xf32> to vector<1x128xf32>
    %156 = vector.broadcast %154 : vector<1x1xf32> to vector<1x128xf32>
    %157 = arith.mulf %156, %155 : vector<1x128xf32>
    %158 = arith.addf %153, %157 : vector<1x128xf32>
    %159 = vector.extract_strided_slice %113 {offsets = [0, 9], sizes = [1, 1], strides = [1, 1]} : vector<1x32xf32> to vector<1x1xf32>
    %160 = vector.extract_strided_slice %112 {offsets = [9, 0], sizes = [1, 128], strides = [1, 1]} : vector<32x128xf32> to vector<1x128xf32>
    %161 = vector.broadcast %159 : vector<1x1xf32> to vector<1x128xf32>
    %162 = arith.mulf %161, %160 : vector<1x128xf32>
    %163 = arith.addf %158, %162 : vector<1x128xf32>
    %164 = vector.extract_strided_slice %113 {offsets = [0, 10], sizes = [1, 1], strides = [1, 1]} : vector<1x32xf32> to vector<1x1xf32>
    %165 = vector.extract_strided_slice %112 {offsets = [10, 0], sizes = [1, 128], strides = [1, 1]} : vector<32x128xf32> to vector<1x128xf32>
    %166 = vector.broadcast %164 : vector<1x1xf32> to vector<1x128xf32>
    %167 = arith.mulf %166, %165 : vector<1x128xf32>
    %168 = arith.addf %163, %167 : vector<1x128xf32>
    %169 = vector.extract_strided_slice %113 {offsets = [0, 11], sizes = [1, 1], strides = [1, 1]} : vector<1x32xf32> to vector<1x1xf32>
    %170 = vector.extract_strided_slice %112 {offsets = [11, 0], sizes = [1, 128], strides = [1, 1]} : vector<32x128xf32> to vector<1x128xf32>
    %171 = vector.broadcast %169 : vector<1x1xf32> to vector<1x128xf32>
    %172 = arith.mulf %171, %170 : vector<1x128xf32>
    %173 = arith.addf %168, %172 : vector<1x128xf32>
    %174 = vector.extract_strided_slice %113 {offsets = [0, 12], sizes = [1, 1], strides = [1, 1]} : vector<1x32xf32> to vector<1x1xf32>
    %175 = vector.extract_strided_slice %112 {offsets = [12, 0], sizes = [1, 128], strides = [1, 1]} : vector<32x128xf32> to vector<1x128xf32>
    %176 = vector.broadcast %174 : vector<1x1xf32> to vector<1x128xf32>
    %177 = arith.mulf %176, %175 : vector<1x128xf32>
    %178 = arith.addf %173, %177 : vector<1x128xf32>
    %179 = vector.extract_strided_slice %113 {offsets = [0, 13], sizes = [1, 1], strides = [1, 1]} : vector<1x32xf32> to vector<1x1xf32>
    %180 = vector.extract_strided_slice %112 {offsets = [13, 0], sizes = [1, 128], strides = [1, 1]} : vector<32x128xf32> to vector<1x128xf32>
    %181 = vector.broadcast %179 : vector<1x1xf32> to vector<1x128xf32>
    %182 = arith.mulf %181, %180 : vector<1x128xf32>
    %183 = arith.addf %178, %182 : vector<1x128xf32>
    %184 = vector.extract_strided_slice %113 {offsets = [0, 14], sizes = [1, 1], strides = [1, 1]} : vector<1x32xf32> to vector<1x1xf32>
    %185 = vector.extract_strided_slice %112 {offsets = [14, 0], sizes = [1, 128], strides = [1, 1]} : vector<32x128xf32> to vector<1x128xf32>
    %186 = vector.broadcast %184 : vector<1x1xf32> to vector<1x128xf32>
    %187 = arith.mulf %186, %185 : vector<1x128xf32>
    %188 = arith.addf %183, %187 : vector<1x128xf32>
    %189 = vector.extract_strided_slice %113 {offsets = [0, 15], sizes = [1, 1], strides = [1, 1]} : vector<1x32xf32> to vector<1x1xf32>
    %190 = vector.extract_strided_slice %112 {offsets = [15, 0], sizes = [1, 128], strides = [1, 1]} : vector<32x128xf32> to vector<1x128xf32>
    %191 = vector.broadcast %189 : vector<1x1xf32> to vector<1x128xf32>
    %192 = arith.mulf %191, %190 : vector<1x128xf32>
    %193 = arith.addf %188, %192 : vector<1x128xf32>
    %194 = vector.extract_strided_slice %113 {offsets = [0, 16], sizes = [1, 1], strides = [1, 1]} : vector<1x32xf32> to vector<1x1xf32>
    %195 = vector.extract_strided_slice %112 {offsets = [16, 0], sizes = [1, 128], strides = [1, 1]} : vector<32x128xf32> to vector<1x128xf32>
    %196 = vector.broadcast %194 : vector<1x1xf32> to vector<1x128xf32>
    %197 = arith.mulf %196, %195 : vector<1x128xf32>
    %198 = arith.addf %193, %197 : vector<1x128xf32>
    %199 = vector.extract_strided_slice %113 {offsets = [0, 17], sizes = [1, 1], strides = [1, 1]} : vector<1x32xf32> to vector<1x1xf32>
    %200 = vector.extract_strided_slice %112 {offsets = [17, 0], sizes = [1, 128], strides = [1, 1]} : vector<32x128xf32> to vector<1x128xf32>
    %201 = vector.broadcast %199 : vector<1x1xf32> to vector<1x128xf32>
    %202 = arith.mulf %201, %200 : vector<1x128xf32>
    %203 = arith.addf %198, %202 : vector<1x128xf32>
    %204 = vector.extract_strided_slice %113 {offsets = [0, 18], sizes = [1, 1], strides = [1, 1]} : vector<1x32xf32> to vector<1x1xf32>
    %205 = vector.extract_strided_slice %112 {offsets = [18, 0], sizes = [1, 128], strides = [1, 1]} : vector<32x128xf32> to vector<1x128xf32>
    %206 = vector.broadcast %204 : vector<1x1xf32> to vector<1x128xf32>
    %207 = arith.mulf %206, %205 : vector<1x128xf32>
    %208 = arith.addf %203, %207 : vector<1x128xf32>
    %209 = vector.extract_strided_slice %113 {offsets = [0, 19], sizes = [1, 1], strides = [1, 1]} : vector<1x32xf32> to vector<1x1xf32>
    %210 = vector.extract_strided_slice %112 {offsets = [19, 0], sizes = [1, 128], strides = [1, 1]} : vector<32x128xf32> to vector<1x128xf32>
    %211 = vector.broadcast %209 : vector<1x1xf32> to vector<1x128xf32>
    %212 = arith.mulf %211, %210 : vector<1x128xf32>
    %213 = arith.addf %208, %212 : vector<1x128xf32>
    %214 = vector.extract_strided_slice %113 {offsets = [0, 20], sizes = [1, 1], strides = [1, 1]} : vector<1x32xf32> to vector<1x1xf32>
    %215 = vector.extract_strided_slice %112 {offsets = [20, 0], sizes = [1, 128], strides = [1, 1]} : vector<32x128xf32> to vector<1x128xf32>
    %216 = vector.broadcast %214 : vector<1x1xf32> to vector<1x128xf32>
    %217 = arith.mulf %216, %215 : vector<1x128xf32>
    %218 = arith.addf %213, %217 : vector<1x128xf32>
    %219 = vector.extract_strided_slice %113 {offsets = [0, 21], sizes = [1, 1], strides = [1, 1]} : vector<1x32xf32> to vector<1x1xf32>
    %220 = vector.extract_strided_slice %112 {offsets = [21, 0], sizes = [1, 128], strides = [1, 1]} : vector<32x128xf32> to vector<1x128xf32>
    %221 = vector.broadcast %219 : vector<1x1xf32> to vector<1x128xf32>
    %222 = arith.mulf %221, %220 : vector<1x128xf32>
    %223 = arith.addf %218, %222 : vector<1x128xf32>
    %224 = vector.extract_strided_slice %113 {offsets = [0, 22], sizes = [1, 1], strides = [1, 1]} : vector<1x32xf32> to vector<1x1xf32>
    %225 = vector.extract_strided_slice %112 {offsets = [22, 0], sizes = [1, 128], strides = [1, 1]} : vector<32x128xf32> to vector<1x128xf32>
    %226 = vector.broadcast %224 : vector<1x1xf32> to vector<1x128xf32>
    %227 = arith.mulf %226, %225 : vector<1x128xf32>
    %228 = arith.addf %223, %227 : vector<1x128xf32>
    %229 = vector.extract_strided_slice %113 {offsets = [0, 23], sizes = [1, 1], strides = [1, 1]} : vector<1x32xf32> to vector<1x1xf32>
    %230 = vector.extract_strided_slice %112 {offsets = [23, 0], sizes = [1, 128], strides = [1, 1]} : vector<32x128xf32> to vector<1x128xf32>
    %231 = vector.broadcast %229 : vector<1x1xf32> to vector<1x128xf32>
    %232 = arith.mulf %231, %230 : vector<1x128xf32>
    %233 = arith.addf %228, %232 : vector<1x128xf32>
    %234 = vector.extract_strided_slice %113 {offsets = [0, 24], sizes = [1, 1], strides = [1, 1]} : vector<1x32xf32> to vector<1x1xf32>
    %235 = vector.extract_strided_slice %112 {offsets = [24, 0], sizes = [1, 128], strides = [1, 1]} : vector<32x128xf32> to vector<1x128xf32>
    %236 = vector.broadcast %234 : vector<1x1xf32> to vector<1x128xf32>
    %237 = arith.mulf %236, %235 : vector<1x128xf32>
    %238 = arith.addf %233, %237 : vector<1x128xf32>
    %239 = vector.extract_strided_slice %113 {offsets = [0, 25], sizes = [1, 1], strides = [1, 1]} : vector<1x32xf32> to vector<1x1xf32>
    %240 = vector.extract_strided_slice %112 {offsets = [25, 0], sizes = [1, 128], strides = [1, 1]} : vector<32x128xf32> to vector<1x128xf32>
    %241 = vector.broadcast %239 : vector<1x1xf32> to vector<1x128xf32>
    %242 = arith.mulf %241, %240 : vector<1x128xf32>
    %243 = arith.addf %238, %242 : vector<1x128xf32>
    %244 = vector.extract_strided_slice %113 {offsets = [0, 26], sizes = [1, 1], strides = [1, 1]} : vector<1x32xf32> to vector<1x1xf32>
    %245 = vector.extract_strided_slice %112 {offsets = [26, 0], sizes = [1, 128], strides = [1, 1]} : vector<32x128xf32> to vector<1x128xf32>
    %246 = vector.broadcast %244 : vector<1x1xf32> to vector<1x128xf32>
    %247 = arith.mulf %246, %245 : vector<1x128xf32>
    %248 = arith.addf %243, %247 : vector<1x128xf32>
    %249 = vector.extract_strided_slice %113 {offsets = [0, 27], sizes = [1, 1], strides = [1, 1]} : vector<1x32xf32> to vector<1x1xf32>
    %250 = vector.extract_strided_slice %112 {offsets = [27, 0], sizes = [1, 128], strides = [1, 1]} : vector<32x128xf32> to vector<1x128xf32>
    %251 = vector.broadcast %249 : vector<1x1xf32> to vector<1x128xf32>
    %252 = arith.mulf %251, %250 : vector<1x128xf32>
    %253 = arith.addf %248, %252 : vector<1x128xf32>
    %254 = vector.extract_strided_slice %113 {offsets = [0, 28], sizes = [1, 1], strides = [1, 1]} : vector<1x32xf32> to vector<1x1xf32>
    %255 = vector.extract_strided_slice %112 {offsets = [28, 0], sizes = [1, 128], strides = [1, 1]} : vector<32x128xf32> to vector<1x128xf32>
    %256 = vector.broadcast %254 : vector<1x1xf32> to vector<1x128xf32>
    %257 = arith.mulf %256, %255 : vector<1x128xf32>
    %258 = arith.addf %253, %257 : vector<1x128xf32>
    %259 = vector.extract_strided_slice %113 {offsets = [0, 29], sizes = [1, 1], strides = [1, 1]} : vector<1x32xf32> to vector<1x1xf32>
    %260 = vector.extract_strided_slice %112 {offsets = [29, 0], sizes = [1, 128], strides = [1, 1]} : vector<32x128xf32> to vector<1x128xf32>
    %261 = vector.broadcast %259 : vector<1x1xf32> to vector<1x128xf32>
    %262 = arith.mulf %261, %260 : vector<1x128xf32>
    %263 = arith.addf %258, %262 : vector<1x128xf32>
    %264 = vector.extract_strided_slice %113 {offsets = [0, 30], sizes = [1, 1], strides = [1, 1]} : vector<1x32xf32> to vector<1x1xf32>
    %265 = vector.extract_strided_slice %112 {offsets = [30, 0], sizes = [1, 128], strides = [1, 1]} : vector<32x128xf32> to vector<1x128xf32>
    %266 = vector.broadcast %264 : vector<1x1xf32> to vector<1x128xf32>
    %267 = arith.mulf %266, %265 : vector<1x128xf32>
    %268 = arith.addf %263, %267 : vector<1x128xf32>
    %269 = vector.extract_strided_slice %113 {offsets = [0, 31], sizes = [1, 1], strides = [1, 1]} : vector<1x32xf32> to vector<1x1xf32>
    %270 = vector.extract_strided_slice %112 {offsets = [31, 0], sizes = [1, 128], strides = [1, 1]} : vector<32x128xf32> to vector<1x128xf32>
    %271 = vector.broadcast %269 : vector<1x1xf32> to vector<1x128xf32>
    %272 = arith.mulf %271, %270 : vector<1x128xf32>
    %273 = arith.addf %268, %272 : vector<1x128xf32>
    %274 = vector.broadcast %114 : vector<1x1xf32> to vector<1x128xf32>
    %275 = arith.addf %273, %274 : vector<1x128xf32>
    %c0_38 = arith.constant 0 : index
    %c0_39 = arith.constant 0 : index
    %276 = vector.load %arg17[%c0_38, %c0_39] : memref<1x128xf32, #tpu.memory_space<vmem>>, vector<1x128xf32>
    tpu.vector_store %arg17[%c0_38, %c0_39], %275 {strides = array<i32>} : memref<1x128xf32, #tpu.memory_space<vmem>>, vector<1x128xf32>,
    return
  }
  func.func @transform_0(%arg0: i32) -> (i32, i32) {
    %c0_i32 = arith.constant 0 : i32
    %c0_i32_0 = arith.constant 0 : i32
    return %c0_i32, %arg0 : i32, i32
  }
  func.func @transform_1(%arg0: i32) -> (i32, i32) {
    %c0_i32 = arith.constant 0 : i32
    %c0_i32_0 = arith.constant 0 : i32
    %c0_i32_1 = arith.constant 0 : i32
    return %c0_i32, %c0_i32_0 : i32, i32
  }
  func.func @transform_2(%arg0: i32) -> (i32, i32) {
    %c0_i32 = arith.constant 0 : i32
    %c0_i32_0 = arith.constant 0 : i32
    %c0_i32_1 = arith.constant 0 : i32
    return %c0_i32, %c0_i32_0 : i32, i32
  }
  func.func @transform_3(%arg0: i32) -> (i32, i32) {
    %c0_i32 = arith.constant 0 : i32
    %c0_i32_0 = arith.constant 0 : i32
    %c0_i32_1 = arith.constant 0 : i32
    return %c0_i32, %c0_i32_0 : i32, i32
  }
  func.func @transform_4(%arg0: i32) -> (i32, i32) {
    %c0_i32 = arith.constant 0 : i32
    %c0_i32_0 = arith.constant 0 : i32
    %c0_i32_1 = arith.constant 0 : i32
    return %c0_i32, %c0_i32_0 : i32, i32
  }
  func.func @transform_5(%arg0: i32) -> (i32, i32) {
    %c0_i32 = arith.constant 0 : i32
    %c0_i32_0 = arith.constant 0 : i32
    %c0_i32_1 = arith.constant 0 : i32
    return %c0_i32, %c0_i32_0 : i32, i32
  }
  func.func @transform_6(%arg0: i32) -> (i32, i32) {
    %c0_i32 = arith.constant 0 : i32
    %c0_i32_0 = arith.constant 0 : i32
    %c0_i32_1 = arith.constant 0 : i32
    return %c0_i32, %c0_i32_0 : i32, i32
  }
  func.func @transform_7(%arg0: i32) -> (i32, i32) {
    %c0_i32 = arith.constant 0 : i32
    %c0_i32_0 = arith.constant 0 : i32
    %c0_i32_1 = arith.constant 0 : i32
    return %c0_i32, %c0_i32_0 : i32, i32
  }
  func.func @transform_8(%arg0: i32) -> (i32, i32) {
    %c0_i32 = arith.constant 0 : i32
    %c0_i32_0 = arith.constant 0 : i32
    %c0_i32_1 = arith.constant 0 : i32
    return %c0_i32, %c0_i32_0 : i32, i32
  }
  func.func @transform_9(%arg0: i32) -> (i32, i32) {
    %c0_i32 = arith.constant 0 : i32
    %c0_i32_0 = arith.constant 0 : i32
    %c0_i32_1 = arith.constant 0 : i32
    return %c0_i32, %c0_i32_0 : i32, i32
  }
  func.func @transform_10(%arg0: i32) -> (i32, i32) {
    %c0_i32 = arith.constant 0 : i32
    %c0_i32_0 = arith.constant 0 : i32
    %c0_i32_1 = arith.constant 0 : i32
    return %c0_i32, %c0_i32_0 : i32, i32
  }
  func.func @transform_11(%arg0: i32) -> (i32, i32) {
    %c0_i32 = arith.constant 0 : i32
    %c0_i32_0 = arith.constant 0 : i32
    %c0_i32_1 = arith.constant 0 : i32
    return %c0_i32, %c0_i32_0 : i32, i32
  }
  func.func @transform_12(%arg0: i32) -> (i32, i32) {
    %c0_i32 = arith.constant 0 : i32
    %c0_i32_0 = arith.constant 0 : i32
    %c0_i32_1 = arith.constant 0 : i32
    return %c0_i32, %c0_i32_0 : i32, i32
  }
  func.func @transform_13(%arg0: i32) -> (i32, i32) {
    %c0_i32 = arith.constant 0 : i32
    %c0_i32_0 = arith.constant 0 : i32
    %c0_i32_1 = arith.constant 0 : i32
    return %c0_i32, %c0_i32_0 : i32, i32
  }
  func.func @transform_14(%arg0: i32) -> (i32, i32) {
    %c0_i32 = arith.constant 0 : i32
    %c0_i32_0 = arith.constant 0 : i32
    %c0_i32_1 = arith.constant 0 : i32
    return %c0_i32, %c0_i32_0 : i32, i32
  }
  func.func @transform_15(%arg0: i32) -> (i32, i32) {
    %c0_i32 = arith.constant 0 : i32
    %c0_i32_0 = arith.constant 0 : i32
    %c0_i32_1 = arith.constant 0 : i32
    return %c0_i32, %c0_i32_0 : i32, i32
  }
  func.func @transform_16(%arg0: i32) -> (i32, i32) {
    %c0_i32 = arith.constant 0 : i32
    %c0_i32_0 = arith.constant 0 : i32
    return %c0_i32, %arg0 : i32, i32
  }
}

</mosaic_0001>

<bundles_post_ra>
// kernel: tpu_custom_call.1
= control target key start
LH: loop header
LB: loop body
LE: loop exit
PB: predicated region body
PF: predicated region fallthrough
CT: control target
= control target key end

     0   :  { %s1999_s0 = inlined_call_operand.vmem [shape: f32[4,384], index: 0, kind: input, shape index: {}]   ;;  %s2000_s1 = inlined_call_operand.vmem [shape: f32[4,4], index: 1, kind: input, shape index: {}]   ;;  %s2001_s2 = inlined_call_operand.vmem [shape: f32[4,1], index: 2, kind: input, shape index: {}]   ;;  %s2002_s3 = inlined_call_operand.vmem [shape: f32[4,1], index: 3, kind: input, shape index: {}]   ;;  %s2003_s4 = inlined_call_operand.vmem [shape: f32[4,4], index: 4, kind: input, shape index: {}]   ;;  %s2004_s5 = inlined_call_operand.vmem [shape: f32[4,1], index: 5, kind: input, shape index: {}]   ;;  %s2005_s6 = inlined_call_operand.vmem [shape: f32[32,4], index: 6, kind: input, shape index: {}]   ;;  %s2006_s7 = inlined_call_operand.vmem [shape: f32[32,1], index: 7, kind: input, shape index: {}]   ;;  %s2007_s8 = inlined_call_operand.vmem [shape: f32[32,32], index: 8, kind: input, shape index: {}]   ;;  %s2008_s9 = inlined_call_operand.vmem [shape: f32[32,1], index: 9, kind: input, shape index: {}]   ;;  %s2009_s10 = inlined_call_operand.vmem [shape: f32[32,32], index: 10, kind: input, shape index: {}]   ;;  %s2010_s11 = inlined_call_operand.vmem [shape: f32[32,1], index: 11, kind: input, shape index: {}]   ;;  %s2011_s12 = inlined_call_operand.vmem [shape: f32[32,32], index: 12, kind: input, shape index: {}]   ;;  %s2012_s13 = inlined_call_operand.vmem [shape: f32[32,1], index: 13, kind: input, shape index: {}]   ;;  %s2013_s14 = inlined_call_operand.vmem [shape: f32[1,32], index: 14, kind: input, shape index: {}]   ;;  %s2014_s15 = inlined_call_operand.<no memory space> [shape: f32[1,1], index: 15, kind: input, shape index: {}]   ;;  %s2015_s16 = inlined_call_operand.hbm [shape: f32[1,384], index: 16, kind: output, shape index: {}]  }
   0x1   :  { %2016 = sst [smem:[#allocation6_spill]] %s1999_s0  ;;  %v21_v0 = vstv %s2014_s15 }
   0x2   :  { %2017 = sst [smem:[#allocation7_spill]] %s2000_s1  ;;  %22 = vst [vmem:[#allocation2] sm:$0x1] %v21_v0 }
   0x3   :  { %2018 = sst [smem:[#allocation8_spill]] %s2001_s2 }
   0x4   :  { %2019 = sst [smem:[#allocation9_spill]] %s2002_s3 }
   0x5   :  { %2020 = sst [smem:[#allocation10_spill]] %s2003_s4 }
   0x6   :  { %2021 = sst [smem:[#allocation11_spill]] %s2004_s5 }
   0x7   :  { %23 = vsyncpa [#allocation4], 0 }
   0x8   :  { %25 = vsyncpa [#allocation4 + $0x1], 0  ;;  %s1689_s23 = smov 0   ;;  %s1691_s24 = smov 0  }
   0x9   :  { %s1693_s25 = smov 0   ;;  %s1695_s26 = smov 0  }
   0xa LB: > { %s1710_s15 = sadd.s32 4294967295, %s1567_s26   ;;  %s1346_s27 = sadd.s32 4294967294, %s1567_s26   ;;  %s1567_s26 = sphi %s1695_s26, %s2033_s26   ;;  %s1563_s25 = sphi %s1693_s25, %s2032_s25   ;;  %s1559_s24 = sphi %s1691_s24, %s2031_s24   ;;  %s1555_s23 = sphi %s1689_s23, %s2030_s23  }
   0xb   : > { %s1714_s28 = sadd.s32 1, %s1567_s26   ;;  %s379_s29 = sadd.s32 1, %s1563_s25 }
   0xc   : > { %s376_s30 = ssub.s32 %s1567_s26, %s1714_s28  ;;  %p389_p0 = scmp.ne.s32.totalorder %s1563_s25, %s1559_s24 }
   0xd   : > { %p377_p1 = scmp.eq.s32.totalorder %s376_s30, 0  ;;  %p390_p2 = scmp.eq.s32.totalorder %s1710_s15, 2 }
   0xe   : > { %p395_p3 = scmp.ne.s32.totalorder %s1559_s24, %s1555_s23  ;;  %p396_p4 = scmp.eq.s32.totalorder %s1346_s27, 2 }
   0xf   : > { %s1725_s0 = scalar_select %p377_p1, %s1563_s25, %s379_s29  }
  0x10   : > { %p1727_p5 = por %p390_p2, %p389_p0  ;;  %p1731_p6 = por %p396_p4, %p395_p3 }
  0x11   : > { %p1349_p7 = scmp.ge.s32.totalorder %s1567_s26, 1  ;;  %p466_p8 = scmp.lt.s32.totalorder %s1567_s26, 4 }
  0x13   : > { %p467_p9 = pnand %p1349_p7, %p466_p8 }
  0x14   : > { %s2024_s4 = sld [smem:[#allocation10_spill]] (!%p467_p9)  ;;  %p514_p10 = scmp.lt.s32.totalorder (!%p467_p9), %s1710_s15, 2 }
  0x15   : > { %470 = sbr.rel (%p467_p9) target bundleno = 763 (0x2fb), region = 84  ;;  %s2025_s1 = sld [smem:[#allocation7_spill]] (!%p467_p9) }
  0x16   : > { %s2026_s2 = sld [smem:[#allocation8_spill]] (!%p467_p9)  ;;  %s1287_s30 = scalar_lea.hbm (!%p467_p9), %s2015_s16, %s1710_s15 }
  0x17   : > { %s2027_s5 = sld [smem:[#allocation11_spill]] (!%p467_p9) }
  0x18   : > { %s2028_s3 = sld [smem:[#allocation9_spill]] (!%p467_p9) }
  0x19   : > { %s2029_s20 = sld [smem:[#allocation6_spill]] (!%p467_p9) }
  0x1a   : > { %v522_v1 = vld [vmem:[%s2024_s4] sm:$0xf]  ;;  %v1569_v3 = vmov 2   ;;  %v1570_v4 = vmov 0   ;;  %v1571_v5 = vmov 1   ;;  %v1572_v6 = vmov 3  }
  0x1b   : > { %v519_v2 = vld [vmem:[%s2025_s1] sm:$0xf]  ;;  %1450 = vset.pattern.permute.xlu1 %v1569_v3  ;;  %1452 = vset.pattern.permute.xlu2 %v1570_v4  ;;  %v606_v8 = vld [vmem:[%s2005_s6 + $0x10] sm:$0xff]  ;;  %v607_v11 = vld [vmem:[%s2005_s6 + $0x18] sm:$0xff]  ;;  %s515_s22 = scalar_select %p514_p10, %s1710_s15, 2  ;;  %vm553_vm0 = vcmask 1043456  }
  0x1c   : > { %1448 = vset.pattern.permute.xlu0 %v1570_v4  ;;  %575 = vperm.xlu2 %1452, %v522_v1   ;;  %v520_v7 = vld [vmem:[%s2026_s2] sm:$0xf]  ;;  %v610_v12 = vld [vmem:[%s2006_s7 + $0x10] sm:$0xff]  ;;  %v605_v13 = vld [vmem:[%s2005_s6 + $0x8] sm:$0xff]  ;;  %vm768_vm1 = vcmask 261120   ;;  %s1291_s1 = sshll.u32 %s1287_s30, 4  ;;  %s1292_s1 = int_to_ptr.hbm [resolvable:$true] %s1291_s1 }
  0x1d   : > { %539 = vperm.xlu1 %1450, %v519_v2   ;;  %526 = vperm.xlu0 %1448, %v519_v2   ;;  %v523_v9 = vld [vmem:[%s2027_s5] sm:$0xf]  ;;  %v745_v14 = vld [vmem:[%s2008_s9 + $0x8] sm:$0xff]  ;;  %v820_v16 = vld [vmem:[%s2010_s11 + $0x10] sm:$0xff]  ;;  %s1350_s29 = sshll.u32 %s515_s22, 2  ;;  %s1519_s2 = sshra.s32 %s1292_s1, 4  ;;  %s1520_s2 = int_to_ptr.hbm [resolvable:$true] %s1519_s2 }
  0x1e   : > { %v521_v10 = vld [vmem:[%s2028_s3] sm:$0xf]  ;;  %v894_v18 = vld [vmem:[%s2012_s13 + $0x18] sm:$0xff]  ;;  %v609_v21 = vld [vmem:[%s2006_s7 + $0x8] sm:$0xff]  ;;  %s1521_s22 = scalar_lea.hbm %s1520_s2, 1  ;;  %s1525_s5 = scalar_lea.hbm %s2015_s16, 3 }
  0x1f   : > { %v604_v15 = vld [vmem:[%s2005_s6] sm:$0xff]  ;;  %v611_v19 = vld [vmem:[%s2006_s7 + $0x18] sm:$0xff]  ;;  %v746_v23 = vld [vmem:[%s2008_s9 + $0x10] sm:$0xff]  ;;  %s517_s3 = scalar_lea.vmem %s2029_s20, %s1350_s29  ;;  %p1522_p11 = scmp.ne.s32.totalorder %s1520_s2, %s1521_s22 }
  0x20   : > { %v891_v17 = vld [vmem:[%s2012_s13] sm:$0xff]  ;;  %v747_v24 = vld [vmem:[%s2008_s9 + $0x18] sm:$0xff]  ;;  %v819_v32 = vld [vmem:[%s2010_s11 + $0x8] sm:$0xff]  ;;  %p1526_p0 = scmp.lt.s32.totalorder %s1520_s2, %s2015_s16  ;;  %p1527_p1 = scmp.lt.s32.totalorder %s1525_s5, %s1521_s22 }
  0x21   : > { %v608_v20 = vld [vmem:[%s2006_s7] sm:$0xff]  ;;  %v821_v26 = vld [vmem:[%s2010_s11 + $0x18] sm:$0xff]  ;;  %v893_v42 = vld [vmem:[%s2012_s13 + $0x10] sm:$0xff]  ;;  %p1523_p12 = pnand %p1522_p11, %p1727_p5 }
  0x22   : > { %v1825_v25 = vld [vmem:[%s2013_s14] sm:$0x1]  ;;  %v892_v43 = vld [vmem:[%s2012_s13 + $0x8] sm:$0xff]  ;;  %p1528_p2 = por %p1527_p1, %p1526_p0 }
  0x23   : > { %v744_v27 = vld [vmem:[%s2008_s9] sm:$0xff]  ;;  %p1524_p13 = pneg %p1523_p12 }
  0x24   : > { %1453 = vset.pattern.permute.xlu2 %v1571_v5  ;;  %v818_v31 = vld [vmem:[%s2010_s11] sm:$0xff] }
  0x25   : > { %1451 = vset.pattern.permute.xlu1 %v1572_v6  ;;  %1449 = vset.pattern.permute.xlu0 %v1571_v5  ;;  %v518_v33 = vld [vmem:[%s517_s3] sm:$0xf]  ;;  %s512_s3 = sand.u32 1, %s1559_s24   ;;  %p1529_p3 = pnand %p1528_p2, %p1524_p13 }
  0x26   : > { %580 = vperm.xlu2 %1453, %v522_v1   ;;  %546 = vperm.xlu1 %1451, %v519_v2   ;;  %v529_v34 = vperm.slane %v518_v33, 0  ;;  %v535_v35 = vperm.slane %v518_v33, 1  ;;  %v542_v41 = vperm.slane %v518_v33, 2  ;;  %v549_v46 = vperm.slane %v518_v33, 3  ;;  %s513_s19 = scalar_lea.vmem [#allocation3], %s512_s3  ;;  %s1279_s21 = scalar_lea.sflag [#allocation4], %s512_s3 }
  0x27   : > { %532 = vperm.xlu0 %1449, %v519_v2   ;;  %s1289_s20 = sshll.u32 %s513_s19, 4  ;;  %s1290_s20 = int_to_ptr.vmem [resolvable:$true] %s1289_s20 }
  0x2e   : > { %1455 = vset.pattern.permute.xlu2 %v1570_v4  ;;  %1454 = vset.pattern.permute.xlu1 %v1569_v3 }
  0x2f   : > { %1462 = vset.pattern.permute.xlu0 %v1569_v3  ;;  %563 = vperm.xlu2 %1455, %v520_v7  }
  0x30   : > { %586 = vperm.xlu1 %1454, %v522_v1   ;;  %671 = vperm.xlu0 %1462, %v606_v8  }
  0x37   : > { %600 = vperm.xlu2 %1455, %v523_v9  }
  0x38   : > { %1456 = vset.pattern.permute.xlu1 %v1570_v4  ;;  %1463 = vset.pattern.permute.xlu0 %v1572_v6 }
  0x39   : > { %569 = vperm.xlu1 %1456, %v521_v10   ;;  %592 = vperm.xlu0 %1463, %v522_v1  }
  0x3f   : > { %1457 = vset.pattern.permute.xlu2 %v1571_v5 }
  0x40   : > { %650 = vperm.xlu2 %1457, %v607_v11  }
  0x41   : > { %629 = vperm.xlu1 %1456, %v607_v11   ;;  %696 = vperm.xlu0 %1463, %v606_v8  }
  0x48   : > { %1459 = vset.pattern.permute.xlu2 %v1569_v3 }
  0x49   : > { %1458 = vset.pattern.permute.xlu1 %v1571_v5  ;;  %1468 = vset.pattern.permute.xlu0 %v1570_v4 }
  0x4a   : > { %675 = vperm.xlu2 %1459, %v607_v11   ;;  %646 = vperm.xlu1 %1458, %v606_v8  }
  0x4b   : > { %624 = vperm.xlu0 %1468, %v606_v8  }
  0x52   : > { %1461 = vset.pattern.permute.xlu2 %v1571_v5  ;;  %1460 = vset.pattern.permute.xlu1 %v1570_v4 }
  0x53   : > { %724 = vperm.xlu0 %1468, %v610_v12   ;;  %642 = vperm.xlu2 %1461, %v605_v13  }
  0x54   : > { %619 = vperm.xlu1 %1460, %v605_v13  }
  0x5b   : > { %1465 = vset.pattern.permute.xlu2 %v1570_v4  ;;  %755 = vperm.xlu0 %1468, %v745_v14  }
  0x5c   : > { %1464 = vset.pattern.permute.xlu1 %v1572_v6  ;;  %614 = vperm.xlu2 %1465, %v604_v15  }
  0x5d   : > { %700 = vperm.xlu1 %1464, %v607_v11  }
  0x63   : > { %834 = vperm.xlu0 %1468, %v820_v16  }
  0x64   : > { %1467 = vset.pattern.permute.xlu2 %v1569_v3 }
  0x65   : > { %1466 = vset.pattern.permute.xlu1 %v1571_v5  ;;  %667 = vperm.xlu2 %1467, %v605_v13  }
  0x66   : > { %638 = vperm.xlu1 %1466, %v604_v15  }
  0x6b   : > { %897 = vperm.xlu0 %1468, %v891_v17  }
  0x6d   : > { %1470 = vset.pattern.permute.xlu2 %v1572_v6 }
  0x6e   : > { %1469 = vset.pattern.permute.xlu1 %v1569_v3  ;;  %692 = vperm.xlu2 %1470, %v605_v13  }
  0x6f   : > { %663 = vperm.xlu1 %1469, %v604_v15  }
  0x73   : > { %912 = vperm.xlu0 %1468, %v894_v18  }
  0x76   : > { %688 = vperm.xlu2 %1470, %v604_v15   ;;  %v1814_v22 = vpop.permute.xlu2 %575 }
  0x77   : > { %1471 = vset.pattern.permute.xlu1 %v1570_v4  ;;  %v578_v7 = vmul.f32 %v1814_v22, %v529_v34 }
  0x78   : > { %729 = vperm.xlu1 %1471, %v611_v19  }
  0x7b   : > { %1474 = vset.pattern.permute.xlu0 %v1569_v3 }
  0x7c   : > { %980 = vperm.xlu0 %1474, %v1825_v25  }
  0x7e   : > { %1472 = vset.pattern.permute.xlu2 %v1570_v4 }
  0x7f   : > { %714 = vperm.xlu2 %1472, %v608_v20  }
  0x80   : > { %719 = vperm.xlu1 %1471, %v609_v21   ;;  %v581_v28 = vpop.permute.xlu2 %580 }
  0x81   : > { %v583_v8 = vmul.f32 %v581_v28, %v535_v35 }
  0x83   : > { %v584_v11 = vadd.f32 %v583_v8, %v578_v7 }
  0x87   : > { %760 = vperm.xlu2 %1472, %v746_v23  }
  0x88   : > { %765 = vperm.xlu1 %1471, %v747_v24  }
  0x89   : > { %v564_v36 = vpop.permute.xlu2 %563 }
  0x8f   : > { %839 = vperm.xlu2 %1472, %v821_v26   ;;  %v540_v29 = vpop.permute.xlu1 %539  ;;  %v527_v30 = vpop.permute.xlu0 %526 }
  0x90   : > { %750 = vperm.xlu1 %1471, %v744_v27   ;;  %v530_v39 = vmul.f32 %v529_v34, %v527_v30  ;;  %v543_v45 = vmul.f32 %v542_v41, %v540_v29 }
  0x91   : > { %v601_v47 = vpop.permute.xlu2 %600 }
  0x97   : > { %824 = vperm.xlu2 %1472, %v818_v31  }
  0x98   : > { %829 = vperm.xlu1 %1471, %v819_v32   ;;  %v547_v37 = vpop.permute.xlu1 %546 }
  0x99   : > { %v533_v38 = vpop.permute.xlu0 %532  ;;  %v550_v50 = vmul.f32 %v549_v46, %v547_v37 }
  0x9a   : > { %v536_v40 = vmul.f32 %v535_v35, %v533_v38  ;;  %v651_v54 = vpop.permute.xlu2 %650 }
  0x9c   : > { %v537_v44 = vadd.f32 %v536_v40, %v530_v39 }
  0x9e   : > { %v544_v48 = vadd.f32 %v543_v45, %v537_v44 }
  0x9f   : > { %907 = vperm.xlu2 %1472, %v893_v42  }
  0xa0   : > { %902 = vperm.xlu1 %1471, %v892_v43   ;;  %v551_v51 = vadd.f32 %v550_v50, %v544_v48 }
  0xa2   : > { %v587_v49 = vpop.permute.xlu1 %586  ;;  %v552_v52 = vmul.f32 %v551_v51, %v518_v33  ;;  %v672_v61 = vpop.permute.xlu0 %671 }
  0xa3   : > { %v589_v9 = vmul.f32 %v587_v49, %v542_v41 }
  0xa4   : > { %v554_v55 = vsel %vm553_vm0, %v552_v52, 0.0  ;;  %v676_v59 = vpop.permute.xlu2 %675 }
  0xa5   : > { %v555_v56 = vrot.slane %v554_v55, 4  ;;  %v590_v13 = vadd.f32 %v589_v9, %v584_v11  ;;  %v740_v9 = vld [vmem:[%s2007_s8] sm:$0xff]  ;;  %v743_v11 = vld [vmem:[%s2007_s8 + $0x18] sm:$0xff] }
  0xa7   : > { %1473 = vset.pattern.permute.xlu2 %v1571_v5  ;;  %v556_v58 = vadd.f32 %v555_v56, %v554_v55 }
  0xa8   : > { %964 = vperm.xlu1 %1471, %v1825_v25   ;;  %970 = vperm.xlu2 %1473, %v1825_v25  }
  0xa9   : > { %v557_v60 = vrot.slane %v556_v58, 2 }
  0xab   : > { %v570_v53 = vpop.permute.xlu1 %569  ;;  %v558_v63 = vadd.f32 %v557_v60, %v556_v58  ;;  %v593_v2 = vpop.permute.xlu0 %592 }
  0xac   : > { %v595_v12 = vmul.f32 %v593_v2, %v549_v46 }
  0xad   : > { %v643_v0 = vpop.permute.xlu2 %642  ;;  %v559_v1 = vrot.slane %v558_v63, 1 }
  0xae   : > { %v596_v16 = vadd.f32 %v595_v12, %v590_v13 }
  0xaf   : > { %v560_v3 = vadd.f32 %v559_v1, %v558_v63 }
  0xb0   : > { %1475 = vset.pattern.permute.xlu1 %v1572_v6 }
  0xb1   : > { %990 = vperm.xlu1 %1475, %v1825_v25   ;;  %v566_v6 = vmul.f32 %v564_v36, %v560_v3 }
  0xb3   : > { %v630_v57 = vpop.permute.xlu1 %629  ;;  %v572_v14 = vadd.f32 %v570_v53, %v566_v6  ;;  %v697_v15 = vpop.permute.xlu0 %696  ;;  %v741_v6 = vld [vmem:[%s2007_s8 + $0x8] sm:$0xff] }
  0xb5   : > { %v597_v18 = vadd.f32 %v596_v16, %v572_v14  ;;  %v1574_v16 = vmov 4  }
  0xb6   : > { %v615_v10 = vpop.permute.xlu2 %614  ;;  %1476 = vset.pattern.permute.xlu2 %v1574_v16  ;;  %v890_v16 = vld [vmem:[%s2011_s12 + $0x18] sm:$0xff] }
  0xb7   : > { %v603_v20 = vadd.f32 %v601_v47, %v597_v18  ;;  %1000 = vperm.xlu2 %1476, %v1825_v25  }
  0xb9   : > { %v653_v24 = vperm.slane %v603_v20, 1  ;;  %v632_v26 = vperm.slane %v603_v20, 0  ;;  %v678_v28 = vperm.slane %v603_v20, 2  ;;  %v703_v33 = vperm.slane %v603_v20, 3 }
  0xbb   : > { %v636_v30 = vmul.f32 %v632_v26, %v630_v57  ;;  %v657_v31 = vmul.f32 %v653_v24, %v651_v54  ;;  %v681_v34 = vmul.f32 %v678_v28, %v672_v61  ;;  %v706_v38 = vmul.f32 %v703_v33, %v697_v15 }
  0xbc   : > { %v647_v62 = vpop.permute.xlu1 %646  ;;  %v682_v42 = vmul.f32 %v678_v28, %v676_v59  ;;  %v655_v43 = vmul.f32 %v653_v24, %v643_v0  ;;  %v633_v44 = vmul.f32 %v632_v26, %v615_v10  ;;  %v742_v10 = vld [vmem:[%s2007_s8 + $0x10] sm:$0xff]  ;;  %v1573_v15 = vmov 5  }
  0xbd   : > { %v625_v21 = vpop.permute.xlu0 %624  ;;  %v656_v27 = vmul.f32 %v653_v24, %v647_v62  ;;  %v661_v36 = vadd.f32 %v657_v31, %v636_v30  ;;  %1477 = vset.pattern.permute.xlu1 %v1573_v15  ;;  %v1576_v30 = vmov 6   ;;  %v961_v15 = vld [vmem:[#allocation2] sm:$0x1] }
  0xbe   : > { %v635_v22 = vmul.f32 %v632_v26, %v625_v21  ;;  %1010 = vperm.xlu1 %1477, %v1825_v25  }
  0xbf   : > { %v668_v19 = vpop.permute.xlu2 %667  ;;  %v686_v47 = vadd.f32 %v682_v42, %v661_v36  ;;  %1478 = vset.pattern.permute.xlu2 %v1576_v30  ;;  %v816_v36 = vld [vmem:[%s2009_s10 + $0x10] sm:$0xff]  ;;  %v1582_v42 = vmov 18  }
  0xc0   : > { %v660_v32 = vadd.f32 %v656_v27, %v635_v22  ;;  %v680_v54 = vmul.f32 %v678_v28, %v668_v19  ;;  %1020 = vperm.xlu2 %1478, %v1825_v25  }
  0xc2   : > { %v685_v37 = vadd.f32 %v681_v34, %v660_v32  ;;  %v815_v34 = vld [vmem:[%s2009_s10 + $0x8] sm:$0xff] }
  0xc4   : > { %v710_v45 = vadd.f32 %v706_v38, %v685_v37  ;;  %v817_v37 = vld [vmem:[%s2009_s10 + $0x18] sm:$0xff]  ;;  %v1578_v38 = vmov 13  }
  0xc5   : > { %v725_v48 = vpop.permute.xlu0 %724 }
  0xc6   : > { %v620_v5 = vpop.permute.xlu1 %619  ;;  %v734_v55 = vadd.f32 %v725_v48, %v710_v45  ;;  %v1585_v45 = vmov 7   ;;  %v1587_v48 = vmov 23  }
  0xc7   : > { %v634_v39 = vmul.f32 %v632_v26, %v620_v5  ;;  %1479 = vset.pattern.permute.xlu0 %v1585_v45 }
  0xc8   : > { %v693_v29 = vpop.permute.xlu2 %692  ;;  %v738_v59 = vmax.f32 %v734_v55, 0.0  ;;  %1030 = vperm.xlu0 %1479, %v1825_v25  }
  0xc9   : > { %v659_v50 = vadd.f32 %v655_v43, %v634_v39  ;;  %v705_v58 = vmul.f32 %v703_v33, %v693_v29  ;;  %v1575_v29 = vmov 8   ;;  %v1579_v39 = vmov 9  }
  0xca   : > { %1480 = vset.pattern.permute.xlu1 %v1575_v29  ;;  %1481 = vset.pattern.permute.xlu2 %v1579_v39  ;;  %v1583_v43 = vmov 14  }
  0xcb   : > { %v684_v62 = vadd.f32 %v680_v54, %v659_v50  ;;  %1040 = vperm.xlu1 %1480, %v1825_v25   ;;  %1047 = vperm.xlu2 %1481, %v1825_v25   ;;  %v1591_v54 = vmov 17  }
  0xcd   : > { %v709_v0 = vadd.f32 %v705_v58, %v684_v62  ;;  %v756_v21 = vpop.permute.xlu0 %755 }
  0xcf   : > { %v701_v17 = vpop.permute.xlu1 %700 }
  0xd0   : > { %v707_v40 = vmul.f32 %v703_v33, %v701_v17  ;;  %v689_v49 = vpop.permute.xlu2 %688 }
  0xd1   : > { %v704_v60 = vmul.f32 %v703_v33, %v689_v49  ;;  %v814_v33 = vld [vmem:[%s2009_s10] sm:$0xff]  ;;  %v1588_v49 = vmov 12  }
  0xd2   : > { %v711_v52 = vadd.f32 %v707_v40, %v686_v47  ;;  %v1580_v40 = vmov 15   ;;  %1484 = vset.pattern.permute.xlu0 %v1588_v49 }
  0xd3   : > { %1077 = vperm.xlu0 %1484, %v1825_v25  }
  0xd5   : > { %v835_v55 = vpop.permute.xlu0 %834 }
  0xd8   : > { %v639_v23 = vpop.permute.xlu1 %638 }
  0xd9   : > { %v654_v41 = vmul.f32 %v653_v24, %v639_v23  ;;  %v715_v1 = vpop.permute.xlu2 %714 }
  0xdb   : > { %v658_v51 = vadd.f32 %v654_v41, %v633_v44  ;;  %v1581_v41 = vmov 11   ;;  %v1584_v44 = vmov 20   ;;  %1489 = vset.pattern.permute.xlu0 %v1591_v54 }
  0xdc   : > { %1483 = vset.pattern.permute.xlu2 %v1581_v41  ;;  %1124 = vperm.xlu0 %1489, %v1825_v25  }
  0xdd   : > { %1067 = vperm.xlu2 %1483, %v1825_v25  }
  0xe1   : > { %v664_v35 = vpop.permute.xlu1 %663  ;;  %v761_v17 = vpop.permute.xlu2 %760 }
  0xe2   : > { %v679_v46 = vmul.f32 %v678_v28, %v664_v35  ;;  %v1577_v35 = vmov 10  }
  0xe3   : > { %1482 = vset.pattern.permute.xlu1 %v1577_v35 }
  0xe4   : > { %v683_v56 = vadd.f32 %v679_v46, %v658_v51  ;;  %1057 = vperm.xlu1 %1482, %v1825_v25   ;;  %v1586_v46 = vmov 16   ;;  %v1589_v51 = vmov 19  }
  0xe5   : > { %1486 = vset.pattern.permute.xlu2 %v1583_v43 }
  0xe6   : > { %v708_v63 = vadd.f32 %v704_v60, %v683_v56  ;;  %1097 = vperm.xlu2 %1486, %v1825_v25   ;;  %v1592_v60 = vmov 21  }
  0xe8   : > { %v732_v5 = vadd.f32 %v715_v1, %v708_v63 }
  0xea   : > { %v730_v53 = vpop.permute.xlu1 %729  ;;  %v736_v8 = vmax.f32 %v732_v5, 0.0  ;;  %v1594_v5 = vmov 22  }
  0xeb   : > { %v735_v57 = vadd.f32 %v730_v53, %v711_v52  ;;  %v840_v52 = vpop.permute.xlu2 %839  ;;  %v1590_v53 = vmov 25   ;;  %1494 = vset.pattern.permute.xlu0 %v1594_v5 }
  0xec   : > { %1485 = vset.pattern.permute.xlu1 %v1578_v38  ;;  %1174 = vperm.xlu0 %1494, %v1825_v25  }
  0xed   : > { %v739_v61 = vmax.f32 %v735_v57, 0.0  ;;  %1087 = vperm.xlu1 %1485, %v1825_v25  }
  0xee   : > { %1488 = vset.pattern.permute.xlu2 %v1586_v46 }
  0xef   : > { %793 = vmatpush.msra.mxu0 %v739_v61  ;;  %1365 = vmatpush.msra.mxu3 %v739_v61 }
  0xf0   : > { %1117 = vperm.xlu2 %1488, %v1825_v25  }
  0xf1   : > { %794 = vmatpush.msra.mxu0 %v738_v59  ;;  %1366 = vmatpush.msra.mxu3 %v738_v59 }
  0xf2   : > { %v720_v2 = vpop.permute.xlu1 %719 }
  0xf3   : > { %v733_v3 = vadd.f32 %v720_v2, %v709_v0  ;;  %v825_v0 = vpop.permute.xlu2 %824 }
  0xf5   : > { %v737_v7 = vmax.f32 %v733_v3, 0.0  ;;  %1487 = vset.pattern.permute.xlu1 %v1580_v40  ;;  %v1593_v3 = vmov 28  }
  0xf6   : > { %1107 = vperm.xlu1 %1487, %v1825_v25  }
  0xf7   : > { %795 = vmatpush.msra.mxu0 %v737_v7  ;;  %1367 = vmatpush.msra.mxu3 %v737_v7 }
  0xf8   : > { %1491 = vset.pattern.permute.xlu2 %v1589_v51 }
  0xf9   : > { %796 = vmatpush.msra.mxu0 %v736_v8  ;;  %1368 = vmatpush.msra.mxu3 %v736_v8 }
  0xfa   : > { %1351 = vmatmul.msk.f32.vlgmr.msra.gmra.mxu0 %vm768_vm1, %v740_v9  ;;  %1352 = vmatmul.msk.f32.vlgmr.msra.gmra.mxu3 %vm768_vm1, %v741_v6  ;;  %v766_v14 = vpop.permute.xlu1 %765  ;;  %v887_v9 = vld [vmem:[%s2011_s12] sm:$0xff]  ;;  %v888_v6 = vld [vmem:[%s2011_s12 + $0x8] sm:$0xff] }
  0xfb   : > { %1144 = vperm.xlu2 %1491, %v1825_v25  }
  0xfe   : > { %1490 = vset.pattern.permute.xlu1 %v1582_v42 }
  0xff   : > { %1134 = vperm.xlu1 %1490, %v1825_v25  }
 0x102   : > { %1353 = vmatmul.msk.f32.gmra.mxu3 %vm768_vm1, %v742_v10  ;;  %v751_v27 = vpop.permute.xlu1 %750  ;;  %v1595_v10 = vmov 24  }
 0x103   : > { %1493 = vset.pattern.permute.xlu2 %v1592_v60 }
 0x104   : > { %1164 = vperm.xlu2 %1493, %v1825_v25  }
 0x107   : > { %1492 = vset.pattern.permute.xlu1 %v1584_v44 }
 0x108   : > { %1154 = vperm.xlu1 %1492, %v1825_v25  }
 0x10a   : > { %1354 = vmatmul.msk.f32.gmra.mxu3 %vm768_vm1, %v743_v11  ;;  %v830_v61 = vpop.permute.xlu1 %829  ;;  %v1596_v11 = vmov 30  }
 0x10c   : > { %1496 = vset.pattern.permute.xlu2 %v1595_v10 }
 0x10d   : > { %1194 = vperm.xlu2 %1496, %v1825_v25  }
 0x110   : > { %1495 = vset.pattern.permute.xlu1 %v1587_v48 }
 0x111   : > { %1184 = vperm.xlu1 %1495, %v1825_v25  }
 0x119   : > { %1497 = vset.pattern.permute.xlu1 %v1590_v53 }
 0x11a   : > { %1201 = vperm.xlu1 %1497, %v1825_v25  }
 0x122   : > { %1500 = vset.pattern.permute.xlu1 %v1593_v3 }
 0x123   : > { %1231 = vperm.xlu1 %1500, %v1825_v25  }
 0x12b   : > { %1502 = vset.pattern.permute.xlu1 %v1596_v11 }
 0x12c   : > { %1251 = vperm.xlu1 %1502, %v1825_v25  }
 0x177   : > { %v798_v23 = vpop.f32.mrf.mxu0 }
 0x178   : > { %v799_v22 = vadd.f32 %v798_v23, %v751_v27 }
 0x17a   : > { %v810_v32 = vmax.f32 %v799_v22, 0.0 }
 0x17d   : > { %v801_v12 = vpop.f32.mrf.mxu3 }
 0x17e   : > { %v802_v24 = vadd.f32 %v801_v12, %v756_v21  ;;  %v1597_v12 = vmov 27  }
 0x17f   : > { %1499 = vset.pattern.permute.xlu0 %v1597_v12 }
 0x180   : > { %v811_v31 = vmax.f32 %v802_v24, 0.0  ;;  %1221 = vperm.xlu0 %1499, %v1825_v25  }
 0x185   : > { %v804_v13 = vpop.f32.mrf.mxu3 }
 0x186   : > { %v805_v19 = vadd.f32 %v804_v13, %v761_v17  ;;  %v889_v13 = vld [vmem:[%s2011_s12 + $0x10] sm:$0xff]  ;;  %v1599_v17 = vmov 29  }
 0x188   : > { %v812_v28 = vmax.f32 %v805_v19, 0.0  ;;  %1504 = vset.pattern.permute.xlu0 %v1570_v4  ;;  %v903_v19 = vpop.permute.xlu1 %902 }
 0x189   : > { %1272 = vperm.xlu0 %1504, %v961_v15  }
 0x18d   : > { %v807_v18 = vpop.f32.mrf.mxu3 }
 0x18e   : > { %v808_v20 = vadd.f32 %v807_v18, %v766_v14  ;;  %v1598_v14 = vmov 26   ;;  %v1600_v18 = vmov 31  }
 0x18f   : > { %1498 = vset.pattern.permute.xlu2 %v1598_v14 }
 0x190   : > { %v813_v26 = vmax.f32 %v808_v20, 0.0  ;;  %1211 = vperm.xlu2 %1498, %v1825_v25   ;;  %v1934_v20 = vpop.permute.xlu2 %907  ;;  %v965_v21 = vpop.permute.xlu1 %964 }
 0x191   : > { %v967_v43 = vperm.slane %v965_v21, 0 }
 0x192   : > { %866 = vmatpush.msrb.mxu0 %v813_v26  ;;  %1369 = vmatpush.msra.mxu1 %v813_v26 }
 0x194   : > { %867 = vmatpush.msrb.mxu0 %v812_v28  ;;  %1370 = vmatpush.msra.mxu1 %v812_v28 }
 0x196   : > { %868 = vmatpush.msrb.mxu0 %v811_v31  ;;  %1371 = vmatpush.msra.mxu1 %v811_v31  ;;  %v898_v31 = vpop.permute.xlu0 %897 }
 0x198   : > { %869 = vmatpush.msrb.mxu0 %v810_v32  ;;  %1372 = vmatpush.msra.mxu1 %v810_v32  ;;  %v971_v23 = vpop.permute.xlu2 %970  ;;  %v991_v24 = vpop.permute.xlu1 %990 }
 0x199   : > { %1355 = vmatmul.msk.f32.vlgmr.msrb.gmra.mxu0 %vm768_vm1, %v814_v33  ;;  %1356 = vmatmul.msk.f32.vlgmr.msra.gmra.mxu1 %vm768_vm1, %v815_v34  ;;  %v973_v40 = vperm.slane %v971_v23, 0  ;;  %v993_v44 = vperm.slane %v991_v24, 0 }
 0x19a   : > { %1501 = vset.pattern.permute.xlu2 %v1599_v17 }
 0x19b   : > { %1241 = vperm.xlu2 %1501, %v1825_v25  }
 0x19e   : > { %v1940_v34 = vpop.permute.xlu0 %912 }
 0x1a0   : > { %v1001_v26 = vpop.permute.xlu2 %1000  ;;  %v1011_v27 = vpop.permute.xlu1 %1010 }
 0x1a1   : > { %1357 = vmatmul.msk.f32.gmra.mxu1 %vm768_vm1, %v816_v36  ;;  %v1003_v48 = vperm.slane %v1001_v26, 0  ;;  %v1013_v54 = vperm.slane %v1011_v27, 0 }
 0x1a3   : > { %1503 = vset.pattern.permute.xlu2 %v1600_v18 }
 0x1a4   : > { %1261 = vperm.xlu2 %1503, %v1825_v25  }
 0x1a6   : > { %v981_v36 = vpop.permute.xlu0 %980 }
 0x1a7   : > { %v983_v38 = vperm.slane %v981_v36, 0 }
 0x1a8   : > { %v1021_v4 = vpop.permute.xlu2 %1020  ;;  %v1041_v22 = vpop.permute.xlu1 %1040 }
 0x1a9   : > { %1358 = vmatmul.msk.f32.gmra.mxu1 %vm768_vm1, %v817_v37 }
 0x1b0   : > { %v1048_v28 = vpop.permute.xlu2 %1047  ;;  %v1058_v29 = vpop.permute.xlu1 %1057 }
 0x1b1   : > { %v1050_v10 = vperm.slane %v1048_v28, 0  ;;  %v1060_v15 = vperm.slane %v1058_v29, 0 }
 0x1b8   : > { %v1068_v30 = vpop.permute.xlu2 %1067  ;;  %v1936_v32 = vpop.permute.xlu1 %1087 }
 0x1b9   : > { %v1090_v28 = vperm.slane %v1936_v32, 0 }
 0x1c0   : > { %v1938_v33 = vpop.permute.xlu2 %1097  ;;  %v1942_v25 = vpop.permute.xlu1 %1107 }
 0x1c1   : > { %v1100_v29 = vperm.slane %v1938_v33, 0 }
 0x1c8   : > { %v1944_v35 = vpop.permute.xlu2 %1117  ;;  %v1946_v42 = vpop.permute.xlu1 %1134 }
 0x1c9   : > { %v1137_v33 = vperm.slane %v1946_v42, 0 }
 0x1d0   : > { %v1950_v3 = vpop.permute.xlu1 %1154 }
 0x1d8   : > { %v1185_v36 = vpop.permute.xlu1 %1184 }
 0x216   : > { %v874_v47 = vpop.f32.mrf.mxu1  ;;  %v871_v62 = vpop.f32.mrf.mxu0 }
 0x217   : > { %v875_v59 = vadd.f32 %v874_v47, %v830_v61  ;;  %v872_v1 = vadd.f32 %v871_v62, %v825_v0  ;;  %v1948_v47 = vpop.permute.xlu2 %1144 }
 0x219   : > { %v884_v7 = vmax.f32 %v875_v59, 0.0  ;;  %v883_v8 = vmax.f32 %v872_v1, 0.0 }
 0x21e   : > { %v877_v50 = vpop.f32.mrf.mxu1 }
 0x21f   : > { %v878_v57 = vadd.f32 %v877_v50, %v835_v55 }
 0x221   : > { %v885_v2 = vmax.f32 %v878_v57, 0.0 }
 0x226   : > { %v880_v56 = vpop.f32.mrf.mxu1 }
 0x227   : > { %v881_v58 = vadd.f32 %v880_v56, %v840_v52  ;;  %v1031_v52 = vpop.permute.xlu0 %1030 }
 0x228   : > { %v1033_v60 = vperm.slane %v1031_v52, 0 }
 0x229   : > { %v886_v63 = vmax.f32 %v881_v58, 0.0  ;;  %v1023_v58 = vperm.slane %v1021_v4, 0 }
 0x22b   : > { %939 = vmatpush.msra.mxu0 %v886_v63  ;;  %1373 = vmatpush.msra.mxu2 %v886_v63 }
 0x22d   : > { %940 = vmatpush.msra.mxu0 %v885_v2  ;;  %1374 = vmatpush.msra.mxu2 %v885_v2 }
 0x22f   : > { %941 = vmatpush.msra.mxu0 %v884_v7  ;;  %1375 = vmatpush.msra.mxu2 %v884_v7  ;;  %v1078_v14 = vpop.permute.xlu0 %1077 }
 0x230   : > { %v1080_v21 = vperm.slane %v1078_v14, 0 }
 0x231   : > { %942 = vmatpush.msra.mxu0 %v883_v8  ;;  %1376 = vmatpush.msra.mxu2 %v883_v8 }
 0x232   : > { %1359 = vmatmul.msk.f32.vlgmr.msra.gmra.mxu0 %vm768_vm1, %v887_v9  ;;  %1360 = vmatmul.msk.f32.vlgmr.msra.gmra.mxu2 %vm768_vm1, %v888_v6  ;;  %v1952_v6 = vpop.permute.xlu2 %1164 }
 0x23a   : > { %1361 = vmatmul.msk.f32.gmra.mxu2 %vm768_vm1, %v889_v13  ;;  %v1043_v13 = vperm.slane %v1041_v22, 0 }
 0x242   : > { %1362 = vmatmul.msk.f32.gmra.mxu2 %vm768_vm1, %v890_v16 }
 0x2af   : > { %v944_v37 = vpop.f32.mrf.mxu0 }
 0x2b0   : > { %v945_v39 = vadd.f32 %v944_v37, %v898_v31 }
 0x2b2   : > { %v956_v41 = vmax.f32 %v945_v39, 0.0 }
 0x2b4   : > { %v974_v45 = vmul.f32 %v973_v40, %v956_v41  ;;  %v984_v46 = vmul.f32 %v983_v38, %v956_v41  ;;  %v968_v49 = vmul.f32 %v967_v43, %v956_v41  ;;  %v994_v51 = vmul.f32 %v993_v44, %v956_v41  ;;  %v1956_v40 = vpop.permute.xlu2 %1194 }
 0x2b5   : > { %v947_v53 = vpop.f32.mrf.mxu2  ;;  %v1004_v57 = vmul.f32 %v1003_v48, %v956_v41  ;;  %v1014_v59 = vmul.f32 %v1013_v54, %v956_v41  ;;  %v1024_v2 = vmul.f32 %v1023_v58, %v956_v41  ;;  %v1034_v8 = vmul.f32 %v1033_v60, %v956_v41 }
 0x2b6   : > { %v976_v50 = vrot.slane %v974_v45, 1  ;;  %v986_v56 = vrot.slane %v984_v46, 2  ;;  %v996_v62 = vrot.slane %v994_v51, 3  ;;  %v948_v63 = vadd.f32 %v947_v53, %v903_v19  ;;  %v1125_v45 = vpop.permute.xlu0 %1124 }
 0x2b7   : > { %v1006_v1 = vrot.slane %v1004_v57, 4  ;;  %v1016_v7 = vrot.slane %v1014_v59, 5  ;;  %v1026_v12 = vrot.slane %v1024_v2, 6  ;;  %v1036_v17 = vrot.slane %v1034_v8, 7  ;;  %v1202_v57 = vpop.permute.xlu1 %1201 }
 0x2b8   : > { %v978_v55 = vadd.f32 %v976_v50, %v968_v49  ;;  %v957_v9 = vmax.f32 %v948_v63, 0.0  ;;  %v1070_v19 = vperm.slane %v1068_v30, 0  ;;  %v1110_v46 = vperm.slane %v1942_v25, 0 }
 0x2b9   : > { %v1127_v51 = vperm.slane %v1125_v45, 0  ;;  %v1147_v58 = vperm.slane %v1948_v47, 0  ;;  %v1157_v59 = vperm.slane %v1950_v3, 0 }
 0x2ba   : > { %v988_v61 = vadd.f32 %v986_v56, %v978_v55  ;;  %v1051_v18 = vmul.f32 %v1050_v10, %v957_v9  ;;  %v1044_v23 = vmul.f32 %v1043_v13, %v957_v9  ;;  %v1061_v26 = vmul.f32 %v1060_v15, %v957_v9 }
 0x2bb   : > { %v1071_v31 = vmul.f32 %v1070_v19, %v957_v9  ;;  %v1081_v22 = vmul.f32 %v1080_v21, %v957_v9  ;;  %v1091_v44 = vmul.f32 %v1090_v28, %v957_v9  ;;  %v1101_v50 = vmul.f32 %v1100_v29, %v957_v9 }
 0x2bc   : > { %v998_v0 = vadd.f32 %v996_v62, %v988_v61  ;;  %v1053_v4 = vrot.slane %v1051_v18, 1  ;;  %v1063_v39 = vrot.slane %v1061_v26, 2  ;;  %v1111_v54 = vmul.f32 %v1110_v46, %v957_v9  ;;  %v1212_v62 = vpop.permute.xlu2 %1211 }
 0x2bd   : > { %v950_v37 = vpop.f32.mrf.mxu2  ;;  %v1073_v43 = vrot.slane %v1071_v31, 3  ;;  %v1083_v49 = vrot.slane %v1081_v22, 4  ;;  %v1093_v53 = vrot.slane %v1091_v44, 5  ;;  %v1103_v56 = vrot.slane %v1101_v50, 6 }
 0x2be   : > { %v1008_v5 = vadd.f32 %v1006_v1, %v998_v0  ;;  %v951_v30 = vadd.f32 %v950_v37, %v1934_v20  ;;  %v1120_v20 = vperm.slane %v1944_v35, 0  ;;  %v1113_v61 = vrot.slane %v1111_v54, 7  ;;  %v1175_v2 = vpop.permute.xlu0 %1174 }
 0x2bf   : > { %v1177_v47 = vperm.slane %v1175_v2, 0  ;;  %v1204_v21 = vperm.slane %v1202_v57, 0  ;;  %v1197_v31 = vperm.slane %v1956_v40, 0  ;;  %v1214_v37 = vperm.slane %v1212_v62, 0 }
 0x2c0   : > { %v1018_v11 = vadd.f32 %v1016_v7, %v1008_v5  ;;  %v958_v32 = vmax.f32 %v951_v30, 0.0  ;;  %v1167_v5 = vperm.slane %v1952_v6, 0 }
 0x2c2   : > { %v1028_v16 = vadd.f32 %v1026_v12, %v1018_v11  ;;  %v1128_v25 = vmul.f32 %v1127_v51, %v958_v32  ;;  %v1121_v0 = vmul.f32 %v1120_v20, %v958_v32  ;;  %v1138_v1 = vmul.f32 %v1137_v33, %v958_v32 }
 0x2c3   : > { %v1148_v8 = vmul.f32 %v1147_v58, %v958_v32  ;;  %v1158_v11 = vmul.f32 %v1157_v59, %v958_v32  ;;  %v1187_v12 = vperm.slane %v1185_v36, 0  ;;  %v1168_v15 = vmul.f32 %v1167_v5, %v958_v32 }
 0x2c4   : > { %v1038_v24 = vadd.f32 %v1036_v17, %v1028_v16  ;;  %v1130_v7 = vrot.slane %v1128_v25, 1  ;;  %v1140_v10 = vrot.slane %v1138_v1, 2  ;;  %v1232_v16 = vpop.permute.xlu1 %1231  ;;  %v1178_v19 = vmul.f32 %v1177_v47, %v958_v32  ;;  %v1242_v6 = vpop.permute.xlu2 %1241 }
 0x2c5   : > { %v953_v9 = vpop.f32.mrf.mxu2  ;;  %v1150_v14 = vrot.slane %v1148_v8, 3  ;;  %v1160_v18 = vrot.slane %v1158_v11, 4  ;;  %v1188_v26 = vmul.f32 %v1187_v12, %v958_v32  ;;  %v1234_v29 = vperm.slane %v1232_v16, 0 }
 0x2c6   : > { %v1045_v27 = vadd.f32 %v1044_v23, %v1038_v24  ;;  %v954_v3 = vadd.f32 %v953_v9, %v1940_v34  ;;  %v1170_v24 = vrot.slane %v1168_v15, 5  ;;  %v1180_v28 = vrot.slane %v1178_v19, 6 }
 0x2c7   : > { %v1244_v45 = vperm.slane %v1242_v6, 0 }
 0x2c8   : > { %v1055_v38 = vadd.f32 %v1053_v4, %v1045_v27  ;;  %v959_v27 = vmax.f32 %v954_v3, 0.0  ;;  %v1222_v4 = vpop.permute.xlu0 %1221 }
 0x2c9   : > { %v1224_v34 = vperm.slane %v1222_v4, 0 }
 0x2ca   : > { %v1065_v41 = vadd.f32 %v1063_v39, %v1055_v38  ;;  %v1190_v39 = vrot.slane %v1188_v26, 7  ;;  %v1205_v22 = vmul.f32 %v1204_v21, %v959_v27 }
 0x2cc   : > { %v1075_v48 = vadd.f32 %v1073_v43, %v1065_v41  ;;  %v1198_v41 = vmul.f32 %v1197_v31, %v959_v27  ;;  %v1215_v43 = vmul.f32 %v1214_v37, %v959_v27  ;;  %v1252_v44 = vpop.permute.xlu1 %1251  ;;  %v1262_v50 = vpop.permute.xlu2 %1261 }
 0x2cd   : > { %v1254_v51 = vperm.slane %v1252_v44, 0 }
 0x2ce   : > { %v1085_v52 = vadd.f32 %v1083_v49, %v1075_v48  ;;  %v1207_v48 = vrot.slane %v1205_v22, 1  ;;  %v1225_v49 = vmul.f32 %v1224_v34, %v959_v27  ;;  %v1217_v32 = vrot.slane %v1215_v43, 2 }
 0x2d0   : > { %v1095_v55 = vadd.f32 %v1093_v53, %v1085_v52  ;;  %v1235_v52 = vmul.f32 %v1234_v29, %v959_v27  ;;  %v1264_v53 = vperm.slane %v1262_v50, 0  ;;  %v1227_v33 = vrot.slane %v1225_v49, 3  ;;  %v1273_v25 = vpop.permute.xlu0 %1272 }
 0x2d1   : > { %v1275_v1 = vperm.slane %v1273_v25, 0 }
 0x2d2   : > { %v1105_v60 = vadd.f32 %v1103_v56, %v1095_v55  ;;  %v1245_v55 = vmul.f32 %v1244_v45, %v959_v27  ;;  %v1255_v56 = vmul.f32 %v1254_v51, %v959_v27  ;;  %v1237_v57 = vrot.slane %v1235_v52, 4 }
 0x2d3   : > { %v1265_v58 = vmul.f32 %v1264_v53, %v959_v27 }
 0x2d4   : > { %v1115_v63 = vadd.f32 %v1113_v61, %v1105_v60  ;;  %v1247_v61 = vrot.slane %v1245_v55, 5  ;;  %v1257_v62 = vrot.slane %v1255_v56, 6 }
 0x2d6   : > { %v1122_v42 = vadd.f32 %v1121_v0, %v1115_v63  ;;  %v1267_v63 = vrot.slane %v1265_v58, 7 }
 0x2d8   : > { %v1132_v35 = vadd.f32 %v1130_v7, %v1122_v42 }
 0x2da   : > { %v1142_v13 = vadd.f32 %v1140_v10, %v1132_v35 }
 0x2dc   : > { %v1152_v17 = vadd.f32 %v1150_v14, %v1142_v13 }
 0x2de   : > { %v1162_v23 = vadd.f32 %v1160_v18, %v1152_v17 }
 0x2e0   : > { %v1172_v36 = vadd.f32 %v1170_v24, %v1162_v23 }
 0x2e2   : > { %v1182_v38 = vadd.f32 %v1180_v28, %v1172_v36 }
 0x2e4   : > { %v1192_v30 = vadd.f32 %v1190_v39, %v1182_v38 }
 0x2e6   : > { %v1199_v46 = vadd.f32 %v1198_v41, %v1192_v30 }
 0x2e8   : > { %v1209_v40 = vadd.f32 %v1207_v48, %v1199_v46 }
 0x2ea   : > { %v1219_v54 = vadd.f32 %v1217_v32, %v1209_v40 }
 0x2ec   : > { %v1229_v20 = vadd.f32 %v1227_v33, %v1219_v54 }
 0x2ee   : > { %v1239_v60 = vadd.f32 %v1237_v57, %v1229_v20 }
 0x2f0   : > { %v1249_v59 = vadd.f32 %v1247_v61, %v1239_v60 }
 0x2f2   : > { %v1259_v0 = vadd.f32 %v1257_v62, %v1249_v59 }
 0x2f4   : > { %v1269_v2 = vadd.f32 %v1267_v63, %v1259_v0 }
 0x2f6   : > { %v1276_v5 = vadd.f32 %v1275_v1, %v1269_v2 }
 0x2f8   : > { %1277 = vst [vmem:[%s513_s19] sm:$0x1] %v1276_v5 }
 0x2f9   : > { %1532 = shalt.err (!%p1529_p3)
}
 0x2fa   : > { %1377 = dma.vmem_to_hbm [thread:$0]  (%p1727_p5), %s1290_s20, 16, %s1292_s1, %s1279_s21  }
 0x2fb PF: > { %p1383_p4 = scmp.ge.s32.totalorder %s1567_s26, 2  ;;  %s1303_s3 = sand.u32 1, %s1555_s23  }
 0x2fc   : > { %s1304_s30 = scalar_lea.sflag [#allocation4], %s1303_s3 }
 0x2fd   : > { %p1380_p7 = pnand %p1383_p4, %p1731_p6 }
 0x2ff   : > { %p1381_p8 = pneg %p1380_p7 }
 0x301   : > { %1550 = dma.done.wait (%p1381_p8), %s1304_s30, 16  }
 0x302   : > { %1552 = vsyncadd (%p1381_p8), %s1304_s30, 4294967280  ;;  %p28_p9 = scmp.ge.s32.totalorder %s1714_s28, 5   ;;  %s2030_s23 = smov %s1559_s24 }
 0x303   : > { %s2031_s24 = smov %s1563_s25  ;;  %s2032_s25 = smov %s1725_s0 }
 0x304   : > { %s2033_s26 = smov %s1714_s28  ;;  %30 = sbr.rel (!%p28_p9) target bundleno = 10 (0xa), region = 119 }
 0x309   :  { %1309 = vsyncpa [#allocation4], 1 }
 0x30a   :  { %1311 = vsyncpa [#allocation4 + $0x1], 1 }

</bundles_post_ra>
